<compile_context>
chip_gen: v7x
topology: tpu7x:2x2x1
jax: 0.10.0
libtpu: 0.0.40
codegen_flags: <defaults>
</compile_context>

<pallas_src>
import functools

import jax
import jax.numpy as jnp
from jax.experimental import pallas as pl
from jax.experimental.pallas import tpu as pltpu


# ---------------------------------------------------------------------------
# math helpers (shared by the kernel and the pure-JAX reference)
# ---------------------------------------------------------------------------
_LN_EPS = 1e-5
_INV_SQRT2 = 0.7071067811865476


def _layer_norm(t, g, b):
    mu = jnp.mean(t, axis=-1, keepdims=True)
    var = jnp.mean(jnp.square(t - mu), axis=-1, keepdims=True)
    return (t - mu) * jax.lax.rsqrt(var + _LN_EPS) * g + b


def _gelu_erf(t):
    # exact (erf-based) GELU == torch.nn.GELU(approximate='none')
    return 0.5 * t * (1.0 + jax.lax.erf(t * _INV_SQRT2))


def _gelu_tanh(t):
    # tanh approximation: routes the transcendental through the EUP slot
    c = 0.7978845608028654  # sqrt(2/pi)
    return 0.5 * t * (1.0 + jnp.tanh(c * (t + 0.044715 * t * t * t)))


# packed row-vector indices (all rows have length D == nhid; MLPMixer uses
# token_dim == channel_dim == nhid so t_b1 / c_b1 / c_b2 fit here too)
(_R_LN1_G, _R_LN1_B, _R_TBN1_S, _R_TBN1_H, _R_T_B1,
 _R_LN2_G, _R_LN2_B, _R_C_B1, _R_C_B2) = range(9)
_N_ROWD = 9

# lane-major packed column slab rows: (L, 8, Wmax), long axis on lanes
(_C_TBN2_S, _C_TBN2_H, _C_CBN1_S, _C_CBN1_H, _C_CBN2_S, _C_CBN2_H) = range(6)
_N_COLS = 8


# ---------------------------------------------------------------------------
# fused Pallas kernel: one grid step == one MixerBlock on one batch tile
# ---------------------------------------------------------------------------
def _fused_mixer_kernel(x_ref, rowD_ref, rowP_ref, colsT_ref,
                        tw1_ref, tw2_ref, cw1_ref, cw2_ref, fin_ref,
                        o_ref,
                        acc_ref,
                        *, batch_tile, n_patches, nhid,
                        apply_final_ln, resident_weights, gelu_approx):
    layer = pl.program_id(1)
    n_layers = pl.num_programs(1)
    Bt, P, D = batch_tile, n_patches, nhid
    rows = Bt * P
    gelu = _gelu_tanh if gelu_approx else _gelu_erf

    # Layer 0 for this batch block: pull x into the resident f32 accumulator.
    @pl.when(layer == 0)
    def _():
        acc_ref[...] = x_ref[...].astype(jnp.float32)

    # ---------------- per-layer parameters ----------------------------------
    rd = rowD_ref[0]                                   # (9, D) f32 row vectors
    row = lambda j: rd[j:j + 1, :]                     # (1, D)
    t_b2 = rowP_ref[0]                                 # (1, P) token-mix out bias

    # lane-dense packed per-row BN params: one small (8, Wmax) -> (Wmax, 8)
    # transpose per layer replaces the old (rows, 4) lane-padded DMA blocks.
    cta = jnp.transpose(colsT_ref[0])                  # (Wmax, 8)
    d_cols = cta[:Bt * D, _C_TBN2_S:_C_TBN2_H + 1]     # (Bt*D, 2) per-d BN (token)
    p_cols = cta[:rows, _C_CBN1_S:_C_CBN2_H + 1]       # (rows, 4) per-patch BN (chan)

    if resident_weights:
        # full (L, ...) stacks live in VMEM (constant index_map -> DMA'd once);
        # index the layer dynamically.
        tw1, tw2 = tw1_ref[layer], tw2_ref[layer]
        cw1, cw2 = cw1_ref[layer], cw2_ref[layer]
    else:
        # streamed one layer at a time (double-buffered by Pallas).
        tw1, tw2 = tw1_ref[0], tw2_ref[0]
        cw1, cw2 = cw1_ref[0], cw2_ref[0]

    x = acc_ref[...]                                   # (rows, D) f32

    # ---------------- token mixing (single fused matmul pair) ---------------
    y = _layer_norm(x, row(_R_LN1_G), row(_R_LN1_B))
    y = y * row(_R_TBN1_S) + row(_R_TBN1_H)            # BN, channel = d
    # cast to bf16 BEFORE the transpose (packed bf16 -> cheaper XLU traffic)
    y3 = y.reshape(Bt, P, D).astype(jnp.bfloat16)
    ym = jnp.swapaxes(y3, 1, 2).reshape(Bt * D, P)     # (Bt*D, P) bf16
    h = jnp.dot(ym, tw1, preferred_element_type=jnp.float32) + row(_R_T_B1)
    h = gelu(h)
    h = h * d_cols[:, 0:1] + d_cols[:, 1:2]            # BN, channel = d (per-row)
    z = jnp.dot(h.astype(jnp.bfloat16), tw2,
                preferred_element_type=jnp.float32) + t_b2          # (Bt*D, P)
    zt = jnp.swapaxes(z.reshape(Bt, D, P), 1, 2).reshape(rows, D)   # back to (rows, D)
    acc_ref[...] = x + zt                              # residual -> VMEM (bounds vregs)
    x = acc_ref[...]

    # ---------------- channel mixing (batch-fused, M = rows) ----------------
    y = _layer_norm(x, row(_R_LN2_G), row(_R_LN2_B))
    y = y * p_cols[:, 0:1] + p_cols[:, 1:2]            # BN, channel = patch (per-row)
    hc = jnp.dot(y.astype(jnp.bfloat16), cw1,
                 preferred_element_type=jnp.float32) + row(_R_C_B1)  # (rows, C)
    hc = gelu(hc)
    hc = hc * p_cols[:, 2:3] + p_cols[:, 3:4]          # BN, channel = patch (per-row)
    zc = jnp.dot(hc.astype(jnp.bfloat16), cw2,
                 preferred_element_type=jnp.float32) + row(_R_C_B2)  # (rows, D)
    xo = x + zc
    acc_ref[...] = xo                                  # resident for the next layer

    # Last layer: optional final LayerNorm, single HBM write-back per block.
    @pl.when(layer == n_layers - 1)
    def _():
        out = xo
        if apply_final_ln:                             # static Python flag
            out = _layer_norm(out, fin_ref[0:1, :], fin_ref[1:2, :])
        o_ref[...] = out.astype(o_ref.dtype)


# ---------------------------------------------------------------------------
# wrapper: parameter packing + tiling heuristics + pallas_call
# ---------------------------------------------------------------------------
def _vmem_capacity_bytes():
    try:
        return int(pltpu.get_tpu_info().vmem_capacity_bytes)
    except Exception:
        return 64 * 1024 * 1024      # conservative (v7x per-TC physical VMEM)


def mlp_mixer_forward(params, x, coarsen_adj=None, mask=None, *,
                      batch_tile=None, resident_weights=None, gelu_approx=False):
    """Fused MLPMixer forward.  coarsen_adj / mask are unused (matches reference)."""
    del coarsen_adj, mask
    blocks = params["blocks"]
    final_ln = params["final_ln"]
    B, P, D = x.shape
    L = len(blocks)
    T = blocks[0]["t_w1"].shape[1]
    C = blocks[0]["c_w1"].shape[1]
    assert T == D and C == D, "MLPMixer uses token_dim == channel_dim == nhid"

    f32, bf16 = jnp.float32, jnp.bfloat16
    itemsize = jnp.dtype(x.dtype).itemsize

    # ---- VMEM budget / weight residency decision ---------------------------
    cap = _vmem_capacity_bytes()
    budget = int(cap * 0.55)
    w_layer_bytes = 4 * D * D * 2                  # 4 bf16 matrices per layer
    w_all_bytes = L * w_layer_bytes
    resident = resident_weights
    if resident is None:
        # keep all layers' weights VMEM-resident when (double-buffered) they
        # comfortably fit; otherwise stream per layer (v7x / large models).
        resident = 2 * w_all_bytes <= int(cap * 0.35)

    def est(bt):
        rows_ = bt * P
        wmax_ = bt * max(D, P)
        act = rows_ * D * 4                                   # resident f32 acc
        io = 2 * rows_ * D * itemsize * 2                     # in + out, 2 buffers
        small = 2 * (_N_ROWD * D + P + _N_COLS * wmax_) * 4   # packed params
        wb = 2 * (w_all_bytes if resident else w_layer_bytes)
        return act + io + small + wb

    # ---- batch tile: biggest tile (target ~512 fused rows) within budget ----
    cap_bt = max(1, (512 // P) if batch_tile is None else batch_tile)
    cands = [d for d in range(min(B, cap_bt), 0, -1) if B % d == 0]
    Bt = None
    for d in cands:
        if ((d * P) % 8 == 0 or d == B) and est(d) <= budget:
            Bt = d
            break
    if Bt is None:
        legal = [d for d in range(B, 0, -1)
                 if B % d == 0 and ((d * P) % 8 == 0 or d == B)]
        Bt = min(legal) if legal else B
    # v7x megacore: prefer >= 2 batch blocks when the fused rows stay >= 256.
    if B // Bt < 2:
        for d in cands:
            if d < Bt and (d * P) % 8 == 0 and d * P >= 256 and est(d) <= budget:
                Bt = d
                break
    nb = B // Bt
    rows = Bt * P
    Wmax = Bt * max(D, P)
    vmem_limit = int(min(cap * 0.85, max(48 * 2 ** 20, 2 * est(Bt))))

    # ---- pack per-layer parameters ------------------------------------------
    stack = lambda k: jnp.stack([blk[k] for blk in blocks], axis=0).astype(f32)

    rowD = jnp.stack([stack(k) for k in
                      ("ln1_g", "ln1_b", "t_bn1_s", "t_bn1_h", "t_b1",
                       "ln2_g", "ln2_b", "c_b1", "c_b2")], axis=1)      # (L, 9, D)
    rowP = stack("t_b2")[:, None, :]                                    # (L, 1, P)

    # per-row BN params, shipped lane-major (long axis on lanes):
    #   token-mix BN2 (per-d, tiled Bt times -> length Bt*D) and the four
    #   channel-mix BN vectors (per-patch, tiled Bt times -> length Bt*P).
    def _col_row(k):
        v = jnp.tile(stack(k), (1, Bt))                                 # (L, Bt*n)
        return jnp.pad(v, ((0, 0), (0, Wmax - v.shape[1])))
    colsT = jnp.stack([_col_row("t_bn2_s"), _col_row("t_bn2_h"),
                       _col_row("c_bn1_s"), _col_row("c_bn1_h"),
                       _col_row("c_bn2_s"), _col_row("c_bn2_h"),
                       jnp.zeros((L, Wmax), f32), jnp.zeros((L, Wmax), f32)],
                      axis=1)                                           # (L, 8, Wmax)

    tw1 = jnp.stack([blk["t_w1"] for blk in blocks], 0).astype(bf16)    # (L, P, T)
    tw2 = jnp.stack([blk["t_w2"] for blk in blocks], 0).astype(bf16)    # (L, T, P)
    cw1 = jnp.stack([blk["c_w1"] for blk in blocks], 0).astype(bf16)    # (L, D, C)
    cw2 = jnp.stack([blk["c_w2"] for blk in blocks], 0).astype(bf16)    # (L, C, D)
    fin = (jnp.stack(final_ln, axis=0).astype(f32) if final_ln is not None
           else jnp.zeros((2, D), f32))                                 # (2, D)

    # ---- BlockSpecs ----------------------------------------------------------
    if resident:
        # constant block index -> each weight stack is DMA'd into VMEM once.
        tw1_spec = pl.BlockSpec((L, P, T), lambda b, l: (0, 0, 0))
        tw2_spec = pl.BlockSpec((L, T, P), lambda b, l: (0, 0, 0))
        cw1_spec = pl.BlockSpec((L, D, C), lambda b, l: (0, 0, 0))
        cw2_spec = pl.BlockSpec((L, C, D), lambda b, l: (0, 0, 0))
    else:
        tw1_spec = pl.BlockSpec((1, P, T), lambda b, l: (l, 0, 0))
        tw2_spec = pl.BlockSpec((1, T, P), lambda b, l: (l, 0, 0))
        cw1_spec = pl.BlockSpec((1, D, C), lambda b, l: (l, 0, 0))
        cw2_spec = pl.BlockSpec((1, C, D), lambda b, l: (l, 0, 0))

    kernel = functools.partial(_fused_mixer_kernel,
                               batch_tile=Bt, n_patches=P, nhid=D,
                               apply_final_ln=final_ln is not None,
                               resident_weights=resident,
                               gelu_approx=gelu_approx)

    out = pl.pallas_call(
        kernel,
        grid=(nb, L),
        in_specs=[
            pl.BlockSpec((rows, D), lambda b, l: (b, 0)),            # x (per batch block)
            pl.BlockSpec((1, _N_ROWD, D), lambda b, l: (l, 0, 0)),   # packed row vectors
            pl.BlockSpec((1, 1, P), lambda b, l: (l, 0, 0)),         # token-mix out bias
            pl.BlockSpec((1, _N_COLS, Wmax), lambda b, l: (l, 0, 0)),  # lane-dense columns
            tw1_spec, tw2_spec, cw1_spec, cw2_spec,                  # weights
            pl.BlockSpec((2, D), lambda b, l: (0, 0)),               # final LN (constant)
        ],
        out_specs=pl.BlockSpec((rows, D), lambda b, l: (b, 0)),
        out_shape=jax.ShapeDtypeStruct((B * P, D), x.dtype),
        scratch_shapes=[
            pltpu.VMEM((rows, D), jnp.float32),   # resident activation across layers
        ],
        compiler_params=pltpu.CompilerParams(
            dimension_semantics=("parallel", "arbitrary"),
            vmem_limit_bytes=vmem_limit),
    )(x.reshape(B * P, D), rowD, rowP, colsT, tw1, tw2, cw1, cw2, fin)

    return out.reshape(B, P, D)


# ---------------------------------------------------------------------------
# pure-JAX reference (same eval-mode semantics, same bf16 matmul operands)
# ---------------------------------------------------------------------------
def mlp_mixer_reference(params, x):
    bf16, f32 = jnp.bfloat16, jnp.float32
    x = x.astype(f32)
    for p in params["blocks"]:
        # token mixing
        y = _layer_norm(x, p["ln1_g"], p["ln1_b"])
        yt = jnp.swapaxes(y, 1, 2)                                       # (B, D, P)
        yt = yt * p["t_bn1_s"][:, None] + p["t_bn1_h"][:, None]
        h = jnp.einsum("bdp,pt->bdt", yt.astype(bf16), p["t_w1"].astype(bf16),
                       preferred_element_type=f32) + p["t_b1"]
        h = _gelu_erf(h)
        h = h * p["t_bn2_s"][:, None] + p["t_bn2_h"][:, None]
        zt = jnp.einsum("bdt,tp->bdp", h.astype(bf16), p["t_w2"].astype(bf16),
                        preferred_element_type=f32) + p["t_b2"]
        x = x + jnp.swapaxes(zt, 1, 2)
        # channel mixing
        y = _layer_norm(x, p["ln2_g"], p["ln2_b"])
        y = y * p["c_bn1_s"][:, None] + p["c_bn1_h"][:, None]
        h = jnp.einsum("bpd,dc->bpc", y.astype(bf16), p["c_w1"].astype(bf16),
                       preferred_element_type=f32) + p["c_b1"]
        h = _gelu_erf(h)
        h = h * p["c_bn2_s"][:, None] + p["c_bn2_h"][:, None]
        z = jnp.einsum("bpc,cd->bpd", h.astype(bf16), p["c_w2"].astype(bf16),
                       preferred_element_type=f32) + p["c_b2"]
        x = x + z
    if params["final_ln"] is not None:
        g, b = params["final_ln"]
        x = _layer_norm(x, g, b)
    return x


# ---------------------------------------------------------------------------
# deterministic parameter construction (shapes from MLPMixer.__init__)
# ---------------------------------------------------------------------------
def init_mixer_params(key, nhid, nlayer, n_patches, with_final_norm=True,
                      dtype=jnp.float32):
    token_dim = nhid
    channel_dim = nhid

    def linear(k, fan_in, fan_out):
        kw, kb = jax.random.split(k)
        bound = 1.0 / (fan_in ** 0.5)
        w = jax.random.uniform(kw, (fan_in, fan_out), dtype, -bound, bound)  # torch weight.T
        b = jax.random.uniform(kb, (fan_out,), dtype, -bound, bound)
        return w, b

    def layernorm_params(k, n):
        kg, kb = jax.random.split(k)
        g = 1.0 + 0.05 * jax.random.normal(kg, (n,), dtype)
        b = 0.05 * jax.random.normal(kb, (n,), dtype)
        return g, b

    def bn_fold(k, nfeat, eps):
        # eval-mode BatchNorm1d folded: y = x * scale[c] + shift[c]
        # (eps == the `dim` passed positionally to LazyBatchNorm1d -- reference quirk)
        kg, kb, km, kv = jax.random.split(k, 4)
        gamma = 1.0 + 0.1 * jax.random.normal(kg, (nfeat,), dtype)
        beta = 0.1 * jax.random.normal(kb, (nfeat,), dtype)
        rmean = 0.1 * jax.random.normal(km, (nfeat,), dtype)
        rvar = 1.0 + jax.random.uniform(kv, (nfeat,), dtype, 0.0, 0.5)
        scale = gamma * jax.lax.rsqrt(rvar + float(eps))
        shift = beta - rmean * scale
        return scale, shift

    keys = jax.random.split(key, nlayer + 1)
    blocks = []
    for l in range(nlayer):
        k = jax.random.split(keys[l], 10)
        p = {}
        # token_mix = LayerNorm(nhid) -> (b d p) -> FeedForward(n_patches, token_dim)
        p["ln1_g"], p["ln1_b"] = layernorm_params(k[0], nhid)
        p["t_bn1_s"], p["t_bn1_h"] = bn_fold(k[1], nhid, eps=n_patches)      # channel = D
        p["t_w1"], p["t_b1"] = linear(k[2], n_patches, token_dim)
        p["t_bn2_s"], p["t_bn2_h"] = bn_fold(k[3], nhid, eps=token_dim)      # channel = D
        p["t_w2"], p["t_b2"] = linear(k[4], token_dim, n_patches)
        # channel_mix = LayerNorm(nhid) -> FeedForward(nhid, channel_dim)
        p["ln2_g"], p["ln2_b"] = layernorm_params(k[5], nhid)
        p["c_bn1_s"], p["c_bn1_h"] = bn_fold(k[6], n_patches, eps=nhid)         # channel = P
        p["c_w1"], p["c_b1"] = linear(k[7], nhid, channel_dim)
        p["c_bn2_s"], p["c_bn2_h"] = bn_fold(k[8], n_patches, eps=channel_dim)  # channel = P
        p["c_w2"], p["c_b2"] = linear(k[9], channel_dim, nhid)
        blocks.append(p)

    final_ln = layernorm_params(keys[-1], nhid) if with_final_norm else None
    return {"blocks": blocks, "final_ln": final_ln}


# ---------------------------------------------------------------------------
if __name__ == "__main__":
    B, n_patches, nhid, nlayer = 8, 8, 32, 3

    key = jax.random.PRNGKey(0)
    kx, kp, ka = jax.random.split(key, 3)

    x = jax.random.normal(kx, (B, n_patches, nhid), jnp.float32)
    coarsen_adj = jax.random.normal(ka, (B, n_patches, n_patches), jnp.float32)  # unused
    mask = jnp.ones((B, n_patches), jnp.float32)                                  # unused

    params = init_mixer_params(kp, nhid, nlayer, n_patches, with_final_norm=True)

    ref = jax.block_until_ready(mlp_mixer_reference(params, x))

    # config 1: auto tiling (weights auto-resident in VMEM at this size)
    out1 = jax.block_until_ready(mlp_mixer_forward(params, x, coarsen_adj, mask))
    # config 2: explicit smaller batch tile (2 batch blocks) + per-layer streaming
    out2 = jax.block_until_ready(
        mlp_mixer_forward(params, x, coarsen_adj, mask,
                          batch_tile=4, resident_weights=False))

    for out in (out1, out2):
        assert out.shape == (B, n_patches, nhid), out.shape
        assert bool(jnp.all(jnp.isfinite(out)))
        max_err = float(jnp.max(jnp.abs(out - ref)))
        assert max_err < 2e-2, f"max |kernel - reference| = {max_err}"

    print("KERNEL_OK")
</pallas_src>

<mosaic_0001>
module attributes {stable_mosaic.version = 11 : i64} {
  func.func @_fused_mixer_kernel(%arg0: i32, %arg1: i32, %arg2: memref<64x32xf32, #tpu.memory_space<vmem>>, %arg3: memref<1x9x32xf32, #tpu.memory_space<vmem>>, %arg4: memref<1x1x8xf32, #tpu.memory_space<vmem>>, %arg5: memref<1x8x256xf32, #tpu.memory_space<vmem>>, %arg6: memref<3x8x32xbf16, #tpu.memory_space<vmem>>, %arg7: memref<3x32x8xbf16, #tpu.memory_space<vmem>>, %arg8: memref<3x32x32xbf16, #tpu.memory_space<vmem>>, %arg9: memref<3x32x32xbf16, #tpu.memory_space<vmem>>, %arg10: memref<2x32xf32, #tpu.memory_space<vmem>>, %arg11: memref<64x32xf32, #tpu.memory_space<vmem>>, %arg12: memref<64x32xf32, #tpu.memory_space<vmem>>) attributes {dimension_semantics = [#tpu.dimension_semantics<parallel>, #tpu.dimension_semantics<arbitrary>], iteration_bounds = array<i64: 1, 3>, scalar_prefetch = 0 : i64, scratch_operands = 1 : i64, tpu.core_type = #tpu.core_type<tc>, window_params = [{transform_indices = @transform_0, window_bounds = array<i64: 64, 32>}, {transform_indices = @transform_1, window_bounds = array<i64: 1, 9, 32>}, {transform_indices = @transform_2, window_bounds = array<i64: 1, 1, 8>}, {transform_indices = @transform_3, window_bounds = array<i64: 1, 8, 256>}, {pipeline_mode = #tpu.pipeline_mode<synchronous>, transform_indices = @transform_4, window_bounds = array<i64: 3, 8, 32>}, {pipeline_mode = #tpu.pipeline_mode<synchronous>, transform_indices = @transform_5, window_bounds = array<i64: 3, 32, 8>}, {pipeline_mode = #tpu.pipeline_mode<synchronous>, transform_indices = @transform_6, window_bounds = array<i64: 3, 32, 32>}, {pipeline_mode = #tpu.pipeline_mode<synchronous>, transform_indices = @transform_7, window_bounds = array<i64: 3, 32, 32>}, {pipeline_mode = #tpu.pipeline_mode<synchronous>, transform_indices = @transform_8, window_bounds = array<i64: 2, 32>}, {transform_indices = @transform_9, window_bounds = array<i64: 64, 32>}]} {
    %c0_i32 = arith.constant 0 : i32
    %0 = arith.cmpi eq, %arg1, %c0_i32 : i32
    %1 = arith.extui %0 : i1 to i32
    %c0_i32_0 = arith.constant 0 : i32
    %2 = arith.cmpi ne, %1, %c0_i32_0 : i32
    scf.if %2 {
      %c0_45 = arith.constant 0 : index
      %c0_46 = arith.constant 0 : index
      %146 = vector.load %arg2[%c0_45, %c0_46] : memref<64x32xf32, #tpu.memory_space<vmem>>, vector<64x32xf32>
      %c0_47 = arith.constant 0 : index
      %c0_48 = arith.constant 0 : index
      %147 = vector.load %arg12[%c0_47, %c0_48] : memref<64x32xf32, #tpu.memory_space<vmem>>, vector<64x32xf32>
      tpu.vector_store %arg12[%c0_47, %c0_48], %146 {strides = array<i32>} : memref<64x32xf32, #tpu.memory_space<vmem>>, vector<64x32xf32>,
    } else {
    }
    %c0 = arith.constant 0 : index
    %c0_1 = arith.constant 0 : index
    %c0_2 = arith.constant 0 : index
    %3 = vector.load %arg3[%c0, %c0_1, %c0_2] : memref<1x9x32xf32, #tpu.memory_space<vmem>>, vector<1x9x32xf32>
    %4 = vector.shape_cast %3 : vector<1x9x32xf32> to vector<9x32xf32>
    %c0_3 = arith.constant 0 : index
    %c0_4 = arith.constant 0 : index
    %c0_5 = arith.constant 0 : index
    %5 = vector.load %arg4[%c0_3, %c0_4, %c0_5] : memref<1x1x8xf32, #tpu.memory_space<vmem>>, vector<1x1x8xf32>
    %6 = vector.shape_cast %5 : vector<1x1x8xf32> to vector<1x8xf32>
    %c0_6 = arith.constant 0 : index
    %c0_7 = arith.constant 0 : index
    %c0_8 = arith.constant 0 : index
    %7 = vector.load %arg5[%c0_6, %c0_7, %c0_8] : memref<1x8x256xf32, #tpu.memory_space<vmem>>, vector<1x8x256xf32>
    %8 = vector.shape_cast %7 : vector<1x8x256xf32> to vector<8x256xf32>
    %9 = tpu.transpose %8, [1, 0] : vector<8x256xf32> -> vector<256x8xf32>
    %10 = vector.extract_strided_slice %9 {offsets = [0, 0], sizes = [256, 2], strides = [1, 1]} : vector<256x8xf32> to vector<256x2xf32>
    %11 = vector.extract_strided_slice %9 {offsets = [0, 2], sizes = [64, 4], strides = [1, 1]} : vector<256x8xf32> to vector<64x4xf32>
    %12 = arith.index_cast %arg1 : i32 to index
    %c0_9 = arith.constant 0 : index
    %c0_10 = arith.constant 0 : index
    %13 = vector.load %arg6[%12, %c0_9, %c0_10] : memref<3x8x32xbf16, #tpu.memory_space<vmem>>, vector<1x8x32xbf16>
    %14 = vector.shape_cast %13 : vector<1x8x32xbf16> to vector<8x32xbf16>
    %15 = arith.index_cast %arg1 : i32 to index
    %c0_11 = arith.constant 0 : index
    %c0_12 = arith.constant 0 : index
    %16 = vector.load %arg7[%15, %c0_11, %c0_12] : memref<3x32x8xbf16, #tpu.memory_space<vmem>>, vector<1x32x8xbf16>
    %17 = vector.shape_cast %16 : vector<1x32x8xbf16> to vector<32x8xbf16>
    %18 = arith.index_cast %arg1 : i32 to index
    %c0_13 = arith.constant 0 : index
    %c0_14 = arith.constant 0 : index
    %19 = vector.load %arg8[%18, %c0_13, %c0_14] : memref<3x32x32xbf16, #tpu.memory_space<vmem>>, vector<1x32x32xbf16>
    %20 = vector.shape_cast %19 : vector<1x32x32xbf16> to vector<32x32xbf16>
    %21 = arith.index_cast %arg1 : i32 to index
    %c0_15 = arith.constant 0 : index
    %c0_16 = arith.constant 0 : index
    %22 = vector.load %arg9[%21, %c0_15, %c0_16] : memref<3x32x32xbf16, #tpu.memory_space<vmem>>, vector<1x32x32xbf16>
    %23 = vector.shape_cast %22 : vector<1x32x32xbf16> to vector<32x32xbf16>
    %c0_17 = arith.constant 0 : index
    %c0_18 = arith.constant 0 : index
    %24 = vector.load %arg12[%c0_17, %c0_18] : memref<64x32xf32, #tpu.memory_space<vmem>>, vector<64x32xf32>
    %25 = vector.extract_strided_slice %4 {offsets = [0, 0], sizes = [1, 32], strides = [1, 1]} : vector<9x32xf32> to vector<1x32xf32>
    %26 = vector.extract_strided_slice %4 {offsets = [1, 0], sizes = [1, 32], strides = [1, 1]} : vector<9x32xf32> to vector<1x32xf32>
    %cst = arith.constant dense<0.000000e+00> : vector<64xf32>
    %27 = vector.multi_reduction <add>, %24, %cst [1] : vector<64x32xf32> to vector<64xf32>
    %28 = vector.shape_cast %27 : vector<64xf32> to vector<64x1xf32>
    %cst_19 = arith.constant 3.200000e+01 : f32
    %29 = vector.broadcast %cst_19 : f32 to vector<64x1xf32>
    %30 = arith.divf %28, %29 : vector<64x1xf32>
    %31 = vector.broadcast %30 : vector<64x1xf32> to vector<64x32xf32>
    %32 = arith.subf %24, %31 : vector<64x32xf32>
    %33 = arith.mulf %32, %32 : vector<64x32xf32>
    %cst_20 = arith.constant dense<0.000000e+00> : vector<64xf32>
    %34 = vector.multi_reduction <add>, %33, %cst_20 [1] : vector<64x32xf32> to vector<64xf32>
    %35 = vector.shape_cast %34 : vector<64xf32> to vector<64x1xf32>
    %cst_21 = arith.constant 3.200000e+01 : f32
    %36 = vector.broadcast %cst_21 : f32 to vector<64x1xf32>
    %37 = arith.divf %35, %36 : vector<64x1xf32>
    %38 = vector.broadcast %30 : vector<64x1xf32> to vector<64x32xf32>
    %39 = arith.subf %24, %38 : vector<64x32xf32>
    %cst_22 = arith.constant 9.99999974E-6 : f32
    %40 = vector.broadcast %cst_22 : f32 to vector<64x1xf32>
    %41 = arith.addf %37, %40 : vector<64x1xf32>
    %42 = math.rsqrt %41 : vector<64x1xf32>
    %43 = vector.broadcast %42 : vector<64x1xf32> to vector<64x32xf32>
    %44 = arith.mulf %39, %43 : vector<64x32xf32>
    %45 = vector.broadcast %25 : vector<1x32xf32> to vector<64x32xf32>
    %46 = arith.mulf %44, %45 : vector<64x32xf32>
    %47 = vector.broadcast %26 : vector<1x32xf32> to vector<64x32xf32>
    %48 = arith.addf %46, %47 : vector<64x32xf32>
    %49 = vector.extract_strided_slice %4 {offsets = [2, 0], sizes = [1, 32], strides = [1, 1]} : vector<9x32xf32> to vector<1x32xf32>
    %50 = vector.broadcast %49 : vector<1x32xf32> to vector<64x32xf32>
    %51 = arith.mulf %48, %50 : vector<64x32xf32>
    %52 = vector.extract_strided_slice %4 {offsets = [3, 0], sizes = [1, 32], strides = [1, 1]} : vector<9x32xf32> to vector<1x32xf32>
    %53 = vector.broadcast %52 : vector<1x32xf32> to vector<64x32xf32>
    %54 = arith.addf %51, %53 : vector<64x32xf32>
    %55 = vector.shape_cast %54 : vector<64x32xf32> to vector<8x8x32xf32>
    %56 = arith.truncf %55 : vector<8x8x32xf32> to vector<8x8x32xbf16>
    %57 = tpu.transpose %56, [0, 2, 1] : vector<8x8x32xbf16> -> vector<8x32x8xbf16>
    %58 = vector.shape_cast %57 : vector<8x32x8xbf16> to vector<256x8xbf16>
    %cst_23 = arith.constant dense<0.000000e+00> : vector<256x32xf32>
    %59 = tpu.matmul %58, %14, %cst_23 {dimension_numbers = #tpu.dot_dimension_numbers<[1], [0], [0], [1], [0, 0, 1, 1], [], []>} : vector<256x8xbf16>, vector<8x32xbf16>, vector<256x32xf32> -> vector<256x32xf32>
    %60 = vector.extract_strided_slice %4 {offsets = [4, 0], sizes = [1, 32], strides = [1, 1]} : vector<9x32xf32> to vector<1x32xf32>
    %61 = vector.broadcast %60 : vector<1x32xf32> to vector<256x32xf32>
    %62 = arith.addf %59, %61 : vector<256x32xf32>
    %cst_24 = arith.constant 5.000000e-01 : f32
    %63 = vector.broadcast %cst_24 : f32 to vector<256x32xf32>
    %64 = arith.mulf %63, %62 : vector<256x32xf32>
    %cst_25 = arith.constant 0.707106769 : f32
    %65 = vector.broadcast %cst_25 : f32 to vector<256x32xf32>
    %66 = arith.mulf %62, %65 : vector<256x32xf32>
    %67 = math.erf %66 : vector<256x32xf32>
    %cst_26 = arith.constant 1.000000e+00 : f32
    %68 = vector.broadcast %cst_26 : f32 to vector<256x32xf32>
    %69 = arith.addf %68, %67 : vector<256x32xf32>
    %70 = arith.mulf %64, %69 : vector<256x32xf32>
    %71 = vector.extract_strided_slice %10 {offsets = [0, 0], sizes = [256, 1], strides = [1, 1]} : vector<256x2xf32> to vector<256x1xf32>
    %72 = vector.broadcast %71 : vector<256x1xf32> to vector<256x32xf32>
    %73 = arith.mulf %70, %72 : vector<256x32xf32>
    %74 = vector.extract_strided_slice %10 {offsets = [0, 1], sizes = [256, 1], strides = [1, 1]} : vector<256x2xf32> to vector<256x1xf32>
    %75 = vector.broadcast %74 : vector<256x1xf32> to vector<256x32xf32>
    %76 = arith.addf %73, %75 : vector<256x32xf32>
    %77 = arith.truncf %76 : vector<256x32xf32> to vector<256x32xbf16>
    %cst_27 = arith.constant dense<0.000000e+00> : vector<256x8xf32>
    %78 = tpu.matmul %77, %17, %cst_27 {dimension_numbers = #tpu.dot_dimension_numbers<[1], [0], [0], [1], [0, 0, 1, 1], [], []>} : vector<256x32xbf16>, vector<32x8xbf16>, vector<256x8xf32> -> vector<256x8xf32>
    %79 = vector.broadcast %6 : vector<1x8xf32> to vector<256x8xf32>
    %80 = arith.addf %78, %79 : vector<256x8xf32>
    %81 = vector.shape_cast %80 : vector<256x8xf32> to vector<8x32x8xf32>
    %82 = tpu.transpose %81, [0, 2, 1] : vector<8x32x8xf32> -> vector<8x8x32xf32>
    %83 = vector.shape_cast %82 : vector<8x8x32xf32> to vector<64x32xf32>
    %84 = arith.addf %24, %83 : vector<64x32xf32>
    %c0_28 = arith.constant 0 : index
    %c0_29 = arith.constant 0 : index
    %85 = vector.load %arg12[%c0_28, %c0_29] : memref<64x32xf32, #tpu.memory_space<vmem>>, vector<64x32xf32>
    tpu.vector_store %arg12[%c0_28, %c0_29], %84 {strides = array<i32>} : memref<64x32xf32, #tpu.memory_space<vmem>>, vector<64x32xf32>,
    %c0_30 = arith.constant 0 : index
    %c0_31 = arith.constant 0 : index
    %86 = vector.load %arg12[%c0_30, %c0_31] : memref<64x32xf32, #tpu.memory_space<vmem>>, vector<64x32xf32>
    %87 = vector.extract_strided_slice %4 {offsets = [5, 0], sizes = [1, 32], strides = [1, 1]} : vector<9x32xf32> to vector<1x32xf32>
    %88 = vector.extract_strided_slice %4 {offsets = [6, 0], sizes = [1, 32], strides = [1, 1]} : vector<9x32xf32> to vector<1x32xf32>
    %cst_32 = arith.constant dense<0.000000e+00> : vector<64xf32>
    %89 = vector.multi_reduction <add>, %86, %cst_32 [1] : vector<64x32xf32> to vector<64xf32>
    %90 = vector.shape_cast %89 : vector<64xf32> to vector<64x1xf32>
    %cst_33 = arith.constant 3.200000e+01 : f32
    %91 = vector.broadcast %cst_33 : f32 to vector<64x1xf32>
    %92 = arith.divf %90, %91 : vector<64x1xf32>
    %93 = vector.broadcast %92 : vector<64x1xf32> to vector<64x32xf32>
    %94 = arith.subf %86, %93 : vector<64x32xf32>
    %95 = arith.mulf %94, %94 : vector<64x32xf32>
    %cst_34 = arith.constant dense<0.000000e+00> : vector<64xf32>
    %96 = vector.multi_reduction <add>, %95, %cst_34 [1] : vector<64x32xf32> to vector<64xf32>
    %97 = vector.shape_cast %96 : vector<64xf32> to vector<64x1xf32>
    %cst_35 = arith.constant 3.200000e+01 : f32
    %98 = vector.broadcast %cst_35 : f32 to vector<64x1xf32>
    %99 = arith.divf %97, %98 : vector<64x1xf32>
    %100 = vector.broadcast %92 : vector<64x1xf32> to vector<64x32xf32>
    %101 = arith.subf %86, %100 : vector<64x32xf32>
    %cst_36 = arith.constant 9.99999974E-6 : f32
    %102 = vector.broadcast %cst_36 : f32 to vector<64x1xf32>
    %103 = arith.addf %99, %102 : vector<64x1xf32>
    %104 = math.rsqrt %103 : vector<64x1xf32>
    %105 = vector.broadcast %104 : vector<64x1xf32> to vector<64x32xf32>
    %106 = arith.mulf %101, %105 : vector<64x32xf32>
    %107 = vector.broadcast %87 : vector<1x32xf32> to vector<64x32xf32>
    %108 = arith.mulf %106, %107 : vector<64x32xf32>
    %109 = vector.broadcast %88 : vector<1x32xf32> to vector<64x32xf32>
    %110 = arith.addf %108, %109 : vector<64x32xf32>
    %111 = vector.extract_strided_slice %11 {offsets = [0, 0], sizes = [64, 1], strides = [1, 1]} : vector<64x4xf32> to vector<64x1xf32>
    %112 = vector.broadcast %111 : vector<64x1xf32> to vector<64x32xf32>
    %113 = arith.mulf %110, %112 : vector<64x32xf32>
    %114 = vector.extract_strided_slice %11 {offsets = [0, 1], sizes = [64, 1], strides = [1, 1]} : vector<64x4xf32> to vector<64x1xf32>
    %115 = vector.broadcast %114 : vector<64x1xf32> to vector<64x32xf32>
    %116 = arith.addf %113, %115 : vector<64x32xf32>
    %117 = arith.truncf %116 : vector<64x32xf32> to vector<64x32xbf16>
    %cst_37 = arith.constant dense<0.000000e+00> : vector<64x32xf32>
    %118 = tpu.matmul %117, %20, %cst_37 {dimension_numbers = #tpu.dot_dimension_numbers<[1], [0], [0], [1], [0, 0, 1, 1], [], []>} : vector<64x32xbf16>, vector<32x32xbf16>, vector<64x32xf32> -> vector<64x32xf32>
    %119 = vector.extract_strided_slice %4 {offsets = [7, 0], sizes = [1, 32], strides = [1, 1]} : vector<9x32xf32> to vector<1x32xf32>
    %120 = vector.broadcast %119 : vector<1x32xf32> to vector<64x32xf32>
    %121 = arith.addf %118, %120 : vector<64x32xf32>
    %cst_38 = arith.constant 5.000000e-01 : f32
    %122 = vector.broadcast %cst_38 : f32 to vector<64x32xf32>
    %123 = arith.mulf %122, %121 : vector<64x32xf32>
    %cst_39 = arith.constant 0.707106769 : f32
    %124 = vector.broadcast %cst_39 : f32 to vector<64x32xf32>
    %125 = arith.mulf %121, %124 : vector<64x32xf32>
    %126 = math.erf %125 : vector<64x32xf32>
    %cst_40 = arith.constant 1.000000e+00 : f32
    %127 = vector.broadcast %cst_40 : f32 to vector<64x32xf32>
    %128 = arith.addf %127, %126 : vector<64x32xf32>
    %129 = arith.mulf %123, %128 : vector<64x32xf32>
    %130 = vector.extract_strided_slice %11 {offsets = [0, 2], sizes = [64, 1], strides = [1, 1]} : vector<64x4xf32> to vector<64x1xf32>
    %131 = vector.broadcast %130 : vector<64x1xf32> to vector<64x32xf32>
    %132 = arith.mulf %129, %131 : vector<64x32xf32>
    %133 = vector.extract_strided_slice %11 {offsets = [0, 3], sizes = [64, 1], strides = [1, 1]} : vector<64x4xf32> to vector<64x1xf32>
    %134 = vector.broadcast %133 : vector<64x1xf32> to vector<64x32xf32>
    %135 = arith.addf %132, %134 : vector<64x32xf32>
    %136 = arith.truncf %135 : vector<64x32xf32> to vector<64x32xbf16>
    %cst_41 = arith.constant dense<0.000000e+00> : vector<64x32xf32>
    %137 = tpu.matmul %136, %23, %cst_41 {dimension_numbers = #tpu.dot_dimension_numbers<[1], [0], [0], [1], [0, 0, 1, 1], [], []>} : vector<64x32xbf16>, vector<32x32xbf16>, vector<64x32xf32> -> vector<64x32xf32>
    %138 = vector.extract_strided_slice %4 {offsets = [8, 0], sizes = [1, 32], strides = [1, 1]} : vector<9x32xf32> to vector<1x32xf32>
    %139 = vector.broadcast %138 : vector<1x32xf32> to vector<64x32xf32>
    %140 = arith.addf %137, %139 : vector<64x32xf32>
    %141 = arith.addf %86, %140 : vector<64x32xf32>
    %c0_42 = arith.constant 0 : index
    %c0_43 = arith.constant 0 : index
    %142 = vector.load %arg12[%c0_42, %c0_43] : memref<64x32xf32, #tpu.memory_space<vmem>>, vector<64x32xf32>
    tpu.vector_store %arg12[%c0_42, %c0_43], %141 {strides = array<i32>} : memref<64x32xf32, #tpu.memory_space<vmem>>, vector<64x32xf32>,
    %c2_i32 = arith.constant 2 : i32
    %143 = arith.cmpi eq, %arg1, %c2_i32 : i32
    %144 = arith.extui %143 : i1 to i32
    %c0_i32_44 = arith.constant 0 : i32
    %145 = arith.cmpi ne, %144, %c0_i32_44 : i32
    scf.if %145 {
      %c0_45 = arith.constant 0 : index
      %c0_46 = arith.constant 0 : index
      %146 = vector.load %arg10[%c0_45, %c0_46] : memref<2x32xf32, #tpu.memory_space<vmem>>, vector<1x32xf32>
      %c1 = arith.constant 1 : index
      %c0_47 = arith.constant 0 : index
      %147 = vector.load %arg10[%c1, %c0_47] : memref<2x32xf32, #tpu.memory_space<vmem>>, vector<1x32xf32>
      %cst_48 = arith.constant dense<0.000000e+00> : vector<64xf32>
      %148 = vector.multi_reduction <add>, %141, %cst_48 [1] : vector<64x32xf32> to vector<64xf32>
      %149 = vector.shape_cast %148 : vector<64xf32> to vector<64x1xf32>
      %cst_49 = arith.constant 3.200000e+01 : f32
      %150 = vector.broadcast %cst_49 : f32 to vector<64x1xf32>
      %151 = arith.divf %149, %150 : vector<64x1xf32>
      %152 = vector.broadcast %151 : vector<64x1xf32> to vector<64x32xf32>
      %153 = arith.subf %141, %152 : vector<64x32xf32>
      %154 = arith.mulf %153, %153 : vector<64x32xf32>
      %cst_50 = arith.constant dense<0.000000e+00> : vector<64xf32>
      %155 = vector.multi_reduction <add>, %154, %cst_50 [1] : vector<64x32xf32> to vector<64xf32>
      %156 = vector.shape_cast %155 : vector<64xf32> to vector<64x1xf32>
      %cst_51 = arith.constant 3.200000e+01 : f32
      %157 = vector.broadcast %cst_51 : f32 to vector<64x1xf32>
      %158 = arith.divf %156, %157 : vector<64x1xf32>
      %159 = vector.broadcast %151 : vector<64x1xf32> to vector<64x32xf32>
      %160 = arith.subf %141, %159 : vector<64x32xf32>
      %cst_52 = arith.constant 9.99999974E-6 : f32
      %161 = vector.broadcast %cst_52 : f32 to vector<64x1xf32>
      %162 = arith.addf %158, %161 : vector<64x1xf32>
      %163 = math.rsqrt %162 : vector<64x1xf32>
      %164 = vector.broadcast %163 : vector<64x1xf32> to vector<64x32xf32>
      %165 = arith.mulf %160, %164 : vector<64x32xf32>
      %166 = vector.broadcast %146 : vector<1x32xf32> to vector<64x32xf32>
      %167 = arith.mulf %165, %166 : vector<64x32xf32>
      %168 = vector.broadcast %147 : vector<1x32xf32> to vector<64x32xf32>
      %169 = arith.addf %167, %168 : vector<64x32xf32>
      %c0_53 = arith.constant 0 : index
      %c0_54 = arith.constant 0 : index
      %170 = vector.load %arg11[%c0_53, %c0_54] : memref<64x32xf32, #tpu.memory_space<vmem>>, vector<64x32xf32>
      tpu.vector_store %arg11[%c0_53, %c0_54], %169 {strides = array<i32>} : memref<64x32xf32, #tpu.memory_space<vmem>>, vector<64x32xf32>,
    } else {
    }
    return
  }
  func.func @transform_0(%arg0: i32, %arg1: i32) -> (i32, i32) {
    %c0_i32 = arith.constant 0 : i32
    %c0_i32_0 = arith.constant 0 : i32
    return %arg0, %c0_i32 : i32, i32
  }
  func.func @transform_1(%arg0: i32, %arg1: i32) -> (i32, i32, i32) {
    %c0_i32 = arith.constant 0 : i32
    %c0_i32_0 = arith.constant 0 : i32
    %c0_i32_1 = arith.constant 0 : i32
    return %arg1, %c0_i32, %c0_i32_0 : i32, i32, i32
  }
  func.func @transform_2(%arg0: i32, %arg1: i32) -> (i32, i32, i32) {
    %c0_i32 = arith.constant 0 : i32
    %c0_i32_0 = arith.constant 0 : i32
    %c0_i32_1 = arith.constant 0 : i32
    return %arg1, %c0_i32, %c0_i32_0 : i32, i32, i32
  }
  func.func @transform_3(%arg0: i32, %arg1: i32) -> (i32, i32, i32) {
    %c0_i32 = arith.constant 0 : i32
    %c0_i32_0 = arith.constant 0 : i32
    %c0_i32_1 = arith.constant 0 : i32
    return %arg1, %c0_i32, %c0_i32_0 : i32, i32, i32
  }
  func.func @transform_4(%arg0: i32, %arg1: i32) -> (i32, i32, i32) {
    %c0_i32 = arith.constant 0 : i32
    %c0_i32_0 = arith.constant 0 : i32
    %c0_i32_1 = arith.constant 0 : i32
    %c0_i32_2 = arith.constant 0 : i32
    return %c0_i32, %c0_i32_0, %c0_i32_1 : i32, i32, i32
  }
  func.func @transform_5(%arg0: i32, %arg1: i32) -> (i32, i32, i32) {
    %c0_i32 = arith.constant 0 : i32
    %c0_i32_0 = arith.constant 0 : i32
    %c0_i32_1 = arith.constant 0 : i32
    %c0_i32_2 = arith.constant 0 : i32
    return %c0_i32, %c0_i32_0, %c0_i32_1 : i32, i32, i32
  }
  func.func @transform_6(%arg0: i32, %arg1: i32) -> (i32, i32, i32) {
    %c0_i32 = arith.constant 0 : i32
    %c0_i32_0 = arith.constant 0 : i32
    %c0_i32_1 = arith.constant 0 : i32
    %c0_i32_2 = arith.constant 0 : i32
    return %c0_i32, %c0_i32_0, %c0_i32_1 : i32, i32, i32
  }
  func.func @transform_7(%arg0: i32, %arg1: i32) -> (i32, i32, i32) {
    %c0_i32 = arith.constant 0 : i32
    %c0_i32_0 = arith.constant 0 : i32
    %c0_i32_1 = arith.constant 0 : i32
    %c0_i32_2 = arith.constant 0 : i32
    return %c0_i32, %c0_i32_0, %c0_i32_1 : i32, i32, i32
  }
  func.func @transform_8(%arg0: i32, %arg1: i32) -> (i32, i32) {
    %c0_i32 = arith.constant 0 : i32
    %c0_i32_0 = arith.constant 0 : i32
    %c0_i32_1 = arith.constant 0 : i32
    return %c0_i32, %c0_i32_0 : i32, i32
  }
  func.func @transform_9(%arg0: i32, %arg1: i32) -> (i32, i32) {
    %c0_i32 = arith.constant 0 : i32
    %c0_i32_0 = arith.constant 0 : i32
    return %arg0, %c0_i32 : i32, i32
  }
}

</mosaic_0001>

<bundles_post_ra>
// kernel: tpu_custom_call.1
= control target key start
LH: loop header
LB: loop body
LE: loop exit
PB: predicated region body
PF: predicated region fallthrough
CT: control target
= control target key end

     0   :  { %s3353_s30 = smov 0   ;;  %s3355_s10 = smov 0   ;;  %s4280_s0 = inlined_call_operand.vmem [shape: f32[64,32], index: 0, kind: input, shape index: {}]   ;;  %s4281_s1 = inlined_call_operand.vmem [shape: f32[3,9,32], index: 1, kind: input, shape index: {}]   ;;  %s4282_s2 = inlined_call_operand.vmem [shape: f32[3,1,8], index: 2, kind: input, shape index: {}]   ;;  %s4283_s3 = inlined_call_operand.vmem [shape: f32[3,8,256], index: 3, kind: input, shape index: {}]   ;;  %s4284_s4 = inlined_call_operand.vmem [shape: bf16[3,8,32], index: 4, kind: input, shape index: {}]   ;;  %s4285_s5 = inlined_call_operand.vmem [shape: bf16[3,32,8], index: 5, kind: input, shape index: {}]   ;;  %s4286_s6 = inlined_call_operand.vmem [shape: bf16[3,32,32], index: 6, kind: input, shape index: {}]   ;;  %s4287_s7 = inlined_call_operand.vmem [shape: bf16[3,32,32], index: 7, kind: input, shape index: {}]   ;;  %s4288_s8 = inlined_call_operand.vmem [shape: f32[2,32], index: 8, kind: input, shape index: {}]   ;;  %s4289_s9 = inlined_call_operand.vmem [shape: f32[64,32], index: 9, kind: output, shape index: {}]  }
   0x1   :  { %s3357_s11 = smov 0  }
   0x2 LB: > { %s28_s12 = sadd.s32 1, %s3291_s10  ;;  %p2856_p0 = scmp.ge.s32.totalorder %s3295_s11, 1  ;;  %s3295_s11 = sphi %s3357_s11, %s19_s11   ;;  %s3291_s10 = sphi %s3355_s10, %s4319_s10   ;;  %s3287_s30 = sphi %s3353_s30, %s4318_s30  }
   0x3   : > { %p29_p1 = scmp.ge.s32.totalorder %s28_s12, 3  ;;  %p328_p2 = scmp.lt.s32.totalorder %s3295_s11, 4 }
   0x5   : > { %s4321_s12 = smov (%p29_p1, %s28_s12), 0  ;;  %p329_p3 = pnand %p2856_p0, %p328_p2 }
   0x7   : > { %332 = sbr.rel (%p329_p3) target bundleno = 2261 (0x8d5), region = 56 }
   0xe   : > { %p383_p4 = scmp.lt.s32.totalorder %s3287_s30, 2  ;;  %p2861_p5 = scmp.ne.s32.totalorder %s3287_s30, 0 }
   0xf   : > { %v407_v0 = vld [vmem:[%s4280_s0] sm:$0xff] (!%p2861_p5)  ;;  %vm415_vm0 = vcmask (!%p2861_p5), 261120   ;;  %v408_v1 = vld [vmem:[%s4280_s0 + $0x8] sm:$0xff] (!%p2861_p5)  ;;  %v409_v2 = vld [vmem:[%s4280_s0 + $0x10] sm:$0xff] (!%p2861_p5) }
  0x10   : > { %s3375_s13 = scalar_select %p383_p4, %s3287_s30, 2 }
  0x11   : > { %406 = sbr.rel (%p2861_p5) target bundleno = 24 (0x18), region = 60  ;;  %416 = vst.msk [vmem:[#allocation2] sm:$0xff] (!%p2861_p5), %vm415_vm0, %v407_v0  ;;  %417 = vst.msk [vmem:[#allocation2 + $0x8] sm:$0xff] (!%p2861_p5), %vm415_vm0, %v408_v1  ;;  %v410_v3 = vld [vmem:[%s4280_s0 + $0x18] sm:$0xff] (!%p2861_p5)  ;;  %v411_v4 = vld [vmem:[%s4280_s0 + $0x20] sm:$0xff] (!%p2861_p5) }
  0x12   : > { %s2922_s14 = sshll.u32 %s3375_s13, 4  ;;  %s390_s17 = scalar_lea.vmem %s4282_s2, %s3375_s13  ;;  %418 = vst.msk [vmem:[#allocation2 + $0x10] sm:$0xff] (!%p2861_p5), %vm415_vm0, %v409_v2  ;;  %v412_v5 = vld [vmem:[%s4280_s0 + $0x28] sm:$0xff] (!%p2861_p5)  ;;  %419 = vst.msk [vmem:[#allocation2 + $0x18] sm:$0xff] (!%p2861_p5), %vm415_vm0, %v410_v3  ;;  %v413_v6 = vld [vmem:[%s4280_s0 + $0x30] sm:$0xff] (!%p2861_p5) }
  0x13   : > { %s3385_s20 = scalar_lea.vmem %s4281_s1, %s2922_s14  ;;  %s3390_s23 = scalar_lea.vmem %s4283_s3, %s2922_s14  ;;  %420 = vst.msk [vmem:[#allocation2 + $0x20] sm:$0xff] (!%p2861_p5), %vm415_vm0, %v411_v4  ;;  %421 = vst.msk [vmem:[#allocation2 + $0x28] sm:$0xff] (!%p2861_p5), %vm415_vm0, %v412_v5  ;;  %v414_v7 = vld [vmem:[%s4280_s0 + $0x38] sm:$0xff] (!%p2861_p5) }
  0x14   : > { %422 = vst.msk [vmem:[#allocation2 + $0x30] sm:$0xff] (!%p2861_p5), %vm415_vm0, %v413_v6  ;;  %423 = vst.msk [vmem:[#allocation2 + $0x38] sm:$0xff] (!%p2861_p5), %vm415_vm0, %v414_v7 }
  0x18 PF: > { %v515_v8 = vld [vmem:[#allocation2] sm:$0xff]  ;;  %vm523_vm1 = vcmask 261120   ;;  %v516_v10 = vld [vmem:[#allocation2 + $0x8] sm:$0xff]  ;;  %s2862_s27 = sshll.u32 %s3287_s30, 2  ;;  %v629_v2 = vlaneseq  ;;  %vm866_vm2 = vcmask 1043456   ;;  %vm817_vm3 = vcmask 64512  }
  0x19   : > { %v517_v9 = vld [vmem:[#allocation2 + $0x10] sm:$0xff]  ;;  %v524_v11 = vsel %vm523_vm1, %v515_v8, 0.0  ;;  %v518_v13 = vld [vmem:[#allocation2 + $0x18] sm:$0xff]  ;;  %v527_v14 = vsel %vm523_vm1, %v516_v10, 0.0  ;;  %s494_s14 = scalar_lea.vmem %s4284_s4, %s2862_s27  ;;  %p2915_p6 = scmp.ne.s32.totalorder %s3287_s30, 2 }
  0x1a   : > { %v530_v12 = vsel %vm523_vm1, %v517_v9, 0.0  ;;  %525 = vadd.xlane.f32.xlu0 %v524_v11  ;;  %v533_v15 = vsel %vm523_vm1, %v518_v13, 0.0  ;;  %v519_v16 = vld [vmem:[#allocation2 + $0x20] sm:$0xff]  ;;  %v520_v17 = vld [vmem:[#allocation2 + $0x28] sm:$0xff] }
  0x1b   : > { %531 = vadd.xlane.f32.xlu1 %v530_v12  ;;  %v536_v18 = vsel %vm523_vm1, %v519_v16, 0.0  ;;  %v539_v19 = vsel %vm523_vm1, %v520_v17, 0.0  ;;  %v521_v20 = vld [vmem:[#allocation2 + $0x30] sm:$0xff]  ;;  %v522_v21 = vld [vmem:[#allocation2 + $0x38] sm:$0xff]  ;;  %v495_v4 = vld [vmem:[%s494_s14] sm:$0xf] }
  0x1c   : > { %v542_v22 = vsel %vm523_vm1, %v521_v20, 0.0  ;;  %v545_v23 = vsel %vm523_vm1, %v522_v21, 0.0  ;;  %3068 = vmatprep.subr.msk.bf16.mxu0 %vm866_vm2, %v495_v4  ;;  %v868_v7 = vsel %vm866_vm2, %v495_v4, 0 }
  0x1d   : > { %2975 = vmatpush3.bf16.msra.mxu0 %v868_v7 }
  0x1e   : > { %528 = vadd.xlane.f32.xlu0 %v527_v14 }
  0x1f   : > { %534 = vadd.xlane.f32.xlu1 %v533_v15 }
  0x22   : > { %537 = vadd.xlane.f32.xlu0 %v536_v18 }
  0x23   : > { %540 = vadd.xlane.f32.xlu1 %v539_v19 }
  0x26   : > { %543 = vadd.xlane.f32.xlu0 %v542_v22 }
  0x27   : > { %546 = vadd.xlane.f32.xlu1 %v545_v23 }
  0xa7   : > { %v526_v24 = vpop.xlane.xlu0 %525 }
  0xa8   : > { %v532_v25 = vpop.xlane.xlu1 %531  ;;  %v549_v26 = vmul.f32 0.03125, %v526_v24 }
  0xa9   : > { %v551_v27 = vmul.f32 0.03125, %v532_v25 }
  0xaa   : > { %v3425_v28 = vsub.f32 %v515_v8, %v549_v26 }
  0xab   : > { %v3427_v29 = vsub.f32 %v517_v9, %v551_v27  ;;  %v529_v30 = vpop.xlane.xlu0 %528 }
  0xac   : > { %v535_v31 = vpop.xlane.xlu1 %534  ;;  %v550_v32 = vmul.f32 0.03125, %v529_v30  ;;  %v565_v34 = vmul.f32 %v3425_v28, %v3425_v28 }
  0xad   : > { %v552_v33 = vmul.f32 0.03125, %v535_v31  ;;  %v567_v35 = vmul.f32 %v3427_v29, %v3427_v29 }
  0xae   : > { %v3433_v36 = vsub.f32 %v516_v10, %v550_v32  ;;  %v573_v38 = vsel %vm523_vm1, %v565_v34, 0.0  ;;  %v3469_v10 = vshrl.u32 %v629_v2, 7 }
  0xaf   : > { %v3435_v37 = vsub.f32 %v518_v13, %v552_v33  ;;  %574 = vadd.xlane.f32.xlu0 %v573_v38  ;;  %v538_v39 = vpop.xlane.xlu0 %537  ;;  %v579_v41 = vsel %vm523_vm1, %v567_v35, 0.0 }
  0xb0   : > { %v541_v40 = vpop.xlane.xlu1 %540  ;;  %v553_v42 = vmul.f32 0.03125, %v538_v39  ;;  %v566_v44 = vmul.f32 %v3433_v36, %v3433_v36  ;;  %4304 = vst [vmem:[#allocation3_spill] sm:$0xff] %v3469_v10  ;;  %v643_v23 = vsub.s32 1, %v3469_v10  ;;  %v655_v27 = vsub.s32 2, %v3469_v10 }
  0xb1   : > { %v554_v43 = vmul.f32 0.03125, %v541_v40  ;;  %v568_v45 = vmul.f32 %v3435_v37, %v3435_v37  ;;  %v667_v38 = vsub.s32 3, %v3469_v10 }
  0xb2   : > { %v3443_v46 = vsub.f32 %v519_v16, %v553_v42  ;;  %v576_v48 = vsel %vm523_vm1, %v566_v44, 0.0 }
  0xb3   : > { %v3445_v47 = vsub.f32 %v520_v17, %v554_v43  ;;  %580 = vadd.xlane.f32.xlu0 %v579_v41  ;;  %577 = vadd.xlane.f32.xlu1 %v576_v48  ;;  %v544_v49 = vpop.xlane.xlu0 %543  ;;  %v582_v51 = vsel %vm523_vm1, %v568_v45, 0.0  ;;  %v631_v17 = vsub.s32 0, %v3469_v10 }
  0xb4   : > { %v547_v50 = vpop.xlane.xlu1 %546  ;;  %v555_v52 = vmul.f32 0.03125, %v544_v49  ;;  %v569_v54 = vmul.f32 %v3443_v46, %v3443_v46 }
  0xb5   : > { %v556_v53 = vmul.f32 0.03125, %v547_v50  ;;  %v570_v55 = vmul.f32 %v3445_v47, %v3445_v47 }
  0xb6   : > { %v3453_v56 = vsub.f32 %v521_v20, %v555_v52  ;;  %v585_v58 = vsel %vm523_vm1, %v569_v54, 0.0  ;;  %v3473_v20 = vld [vmem:[%s3385_s20] sm:$0xff] }
  0xb7   : > { %v3455_v57 = vsub.f32 %v522_v21, %v556_v53  ;;  %583 = vadd.xlane.f32.xlu1 %v582_v51  ;;  %586 = vadd.xlane.f32.xlu0 %v585_v58  ;;  %v588_v59 = vsel %vm523_vm1, %v570_v55, 0.0  ;;  %v632_v26 = vrot.slane %v3473_v20, %v631_v17  ;;  %v644_v35 = vrot.slane %v3473_v20, %v643_v23 }
  0xb8   : > { %v571_v60 = vmul.f32 %v3453_v56, %v3453_v56  ;;  %v656_v41 = vrot.slane %v3473_v20, %v655_v27  ;;  %v668_v48 = vrot.slane %v3473_v20, %v667_v38  ;;  %v3297_v38 = vmov 0  }
  0xb9   : > { %v572_v61 = vmul.f32 %v3455_v57, %v3455_v57 }
  0xba   : > { %v591_v62 = vsel %vm523_vm1, %v571_v60, 0.0 }
  0xbb   : > { %589 = vadd.xlane.f32.xlu1 %v588_v59  ;;  %592 = vadd.xlane.f32.xlu0 %v591_v62  ;;  %v594_v63 = vsel %vm523_vm1, %v572_v61, 0.0 }
  0xbf   : > { %595 = vadd.xlane.f32.xlu1 %v594_v63 }
 0x13c   : > { %v575_v0 = vpop.xlane.xlu0 %574 }
 0x13d   : > { %v597_v1 = vmul.f32 0.03125, %v575_v0 }
 0x13f   : > { %v605_v3 = vadd.f32 1e-05, %v597_v1 }
 0x140   : > { %v578_v5 = vpop.xlane.xlu1 %577  ;;  %v581_v6 = vpop.xlane.xlu0 %580 }
 0x141   : > { %3136 = vrsqrt.f32 %v605_v3  ;;  %v598_v8 = vmul.f32 0.03125, %v578_v5  ;;  %v599_v9 = vmul.f32 0.03125, %v581_v6 }
 0x143   : > { %v606_v11 = vadd.f32 1e-05, %v598_v8  ;;  %v607_v12 = vadd.f32 1e-05, %v599_v9 }
 0x144   : > { %v584_v13 = vpop.xlane.xlu1 %583  ;;  %v587_v14 = vpop.xlane.xlu0 %586 }
 0x145   : > { %3138 = vrsqrt.f32 %v606_v11  ;;  %v600_v15 = vmul.f32 0.03125, %v584_v13  ;;  %v601_v16 = vmul.f32 0.03125, %v587_v14 }
 0x146   : > { %3140 = vrsqrt.f32 %v607_v12 }
 0x147   : > { %v608_v18 = vadd.f32 1e-05, %v600_v15  ;;  %v609_v19 = vadd.f32 1e-05, %v601_v16 }
 0x148   : > { %v590_v21 = vpop.xlane.xlu1 %589  ;;  %v593_v22 = vpop.xlane.xlu0 %592 }
 0x149   : > { %3142 = vrsqrt.f32 %v608_v18  ;;  %v602_v24 = vmul.f32 0.03125, %v590_v21  ;;  %v603_v25 = vmul.f32 0.03125, %v593_v22 }
 0x14a   : > { %3144 = vrsqrt.f32 %v609_v19 }
 0x14b   : > { %v3137_v30 = vpop.eup %3136  ;;  %v610_v31 = vadd.f32 1e-05, %v602_v24  ;;  %v611_v32 = vadd.f32 1e-05, %v603_v25 }
 0x14c   : > { %v596_v33 = vpop.xlane.xlu1 %595  ;;  %v621_v34 = vmul.f32 %v3137_v30, %v3425_v28 }
 0x14d   : > { %3146 = vrsqrt.f32 %v610_v31  ;;  %v604_v39 = vmul.f32 0.03125, %v596_v33 }
 0x14e   : > { %3148 = vrsqrt.f32 %v611_v32  ;;  %v633_v40 = vmul.f32 %v632_v26, %v621_v34  ;;  %v427_v34 = vld [vmem:[%s3390_s23] sm:$0xff] }
 0x14f   : > { %v3139_v42 = vpop.eup %3138  ;;  %v612_v43 = vadd.f32 1e-05, %v604_v39 }
 0x150   : > { %v3141_v44 = vpop.eup %3140  ;;  %v645_v45 = vadd.f32 %v644_v35, %v633_v40  ;;  %v622_v49 = vmul.f32 %v3139_v42, %v3433_v36 }
 0x151   : > { %3150 = vrsqrt.f32 %v612_v43  ;;  %v623_v28 = vmul.f32 %v3141_v44, %v3427_v29 }
 0x152   : > { %v657_v50 = vmul.f32 %v656_v41, %v645_v45  ;;  %v634_v51 = vmul.f32 %v632_v26, %v622_v49 }
 0x153   : > { %v3143_v52 = vpop.eup %3142  ;;  %v635_v53 = vmul.f32 %v632_v26, %v623_v28 }
 0x154   : > { %v3145_v54 = vpop.eup %3144  ;;  %v669_v55 = vadd.f32 %v668_v48, %v657_v50  ;;  %v646_v58 = vadd.f32 %v644_v35, %v634_v51  ;;  %v624_v59 = vmul.f32 %v3143_v52, %v3435_v37 }
 0x155   : > { %v647_v60 = vadd.f32 %v644_v35, %v635_v53  ;;  %v625_v61 = vmul.f32 %v3145_v54, %v3443_v46 }
 0x156   : > { %v677_v62 = vpack.c.bf16 %v669_v55, %v669_v55  ;;  %v658_v63 = vmul.f32 %v656_v41, %v646_v58  ;;  %v636_v0 = vmul.f32 %v632_v26, %v624_v59 }
 0x157   : > { %v3147_v1 = vpop.eup %3146  ;;  %v659_v36 = vmul.f32 %v656_v41, %v647_v60  ;;  %v637_v2 = vmul.f32 %v632_v26, %v625_v61 }
 0x158   : > { %v3149_v3 = vpop.eup %3148  ;;  %685 = vxpose.xlu0.c.b16.start.end [1/1] (short) (narrow) %v677_v62, 32  ;;  %v670_v29 = vadd.f32 %v668_v48, %v658_v63  ;;  %v648_v4 = vadd.f32 %v644_v35, %v636_v0  ;;  %v626_v5 = vmul.f32 %v3147_v1, %v3445_v47  ;;  %v3298_v0 = vmov 1  }
 0x159   : > { %v671_v6 = vadd.f32 %v668_v48, %v659_v36  ;;  %v649_v7 = vadd.f32 %v644_v35, %v637_v2  ;;  %v627_v8 = vmul.f32 %v3149_v3, %v3453_v56 }
 0x15a   : > { %v678_v37 = vpack.c.bf16 %v670_v29, %v670_v29  ;;  %v660_v9 = vmul.f32 %v656_v41, %v648_v4  ;;  %v638_v11 = vmul.f32 %v632_v26, %v626_v5 }
 0x15b   : > { %v3151_v46 = vpop.eup %3150  ;;  %v679_v12 = vpack.c.bf16 %v671_v6, %v671_v6  ;;  %v661_v13 = vmul.f32 %v656_v41, %v649_v7  ;;  %v639_v14 = vmul.f32 %v632_v26, %v627_v8 }
 0x15c   : > { %701 = vxpose.xlu1.c.b16.start.end [1/1] (short) (narrow) %v678_v37, 32  ;;  %v672_v15 = vadd.f32 %v668_v48, %v660_v9  ;;  %v650_v16 = vadd.f32 %v644_v35, %v638_v11  ;;  %v628_v17 = vmul.f32 %v3151_v46, %v3455_v57 }
 0x15d   : > { %717 = vxpose.xlu0.c.b16.start.end [1/1] (short) (narrow) %v679_v12, 32  ;;  %v673_v18 = vadd.f32 %v668_v48, %v661_v13  ;;  %v651_v19 = vadd.f32 %v644_v35, %v639_v14 }
 0x15e   : > { %v680_v47 = vpack.c.bf16 %v672_v15, %v672_v15  ;;  %v662_v21 = vmul.f32 %v656_v41, %v650_v16  ;;  %v640_v22 = vmul.f32 %v632_v26, %v628_v17  ;;  %v428_v26 = vld [vmem:[%s3390_s23 + $0x8] sm:$0xff]  ;;  %s3577_s23 = sshll.u32 %s3287_s30, 4 }
 0x15f   : > { %v663_v56 = vmul.f32 %v656_v41, %v651_v19  ;;  %v681_v23 = vpack.c.bf16 %v673_v18, %v673_v18  ;;  %s498_s18 = scalar_lea.vmem %s4285_s5, %s3577_s23  ;;  %s504_s22 = scalar_lea.vmem %s4286_s6, %s3577_s23 }
 0x160   : > { %v674_v24 = vadd.f32 %v668_v48, %v662_v21  ;;  %v652_v25 = vadd.f32 %v644_v35, %v640_v22  ;;  %v3131_v22 = vld [vmem:[%s498_s18 + $0x8] sm:$0xff]   ;;  %s510_s26 = scalar_lea.vmem %s4287_s7, %s3577_s23 }
 0x161   : > { %733 = vxpose.xlu1.c.b16.start.end [1/1] (short) (narrow) %v680_v47, 32  ;;  %v675_v27 = vadd.f32 %v668_v48, %v663_v56  ;;  %v3130_v47 = vld [vmem:[%s498_s18] sm:$0xff]  }
 0x162   : > { %749 = vxpose.xlu0.c.b16.start.end [1/1] (short) (narrow) %v681_v23, 32  ;;  %v664_v30 = vmul.f32 %v656_v41, %v652_v25  ;;  %v682_v31 = vpack.c.bf16 %v674_v24, %v674_v24  ;;  %3008 = vmatprep.subr.bf16.mxu1 %v3130_v47 }
 0x163   : > { %v683_v32 = vpack.c.bf16 %v675_v27, %v675_v27  ;;  %3009 = vmatpush3.bf16.msra.mxu1 %v3130_v47 }
 0x164   : > { %v676_v33 = vadd.f32 %v668_v48, %v664_v30  ;;  %3010 = vmatprep.subr.bf16.mxu1 %v3131_v22 }
 0x166   : > { %765 = vxpose.xlu1.c.b16.start.end [1/1] (short) (narrow) %v682_v31, 32  ;;  %v684_v57 = vpack.c.bf16 %v676_v33, %v676_v33 }
 0x167   : > { %781 = vxpose.xlu0.c.b16.start.end [1/1] (short) (narrow) %v683_v32, 32  ;;  %3011 = vmatpush3.bf16.msra.mxu1 %v3131_v22 }
 0x16b   : > { %797 = vxpose.xlu1.c.b16.start.end [1/1] (short) (narrow) %v684_v57, 32 }
 0x16f   : > { %429 = vxpose.xlu0.b32.start.end [1/1] (short) %v427_v34, 128  ;;  %v815_v34 = vsub.s32 4, %v3469_v10 }
 0x179   : > { %461 = vxpose.xlu1.b32.start.end [1/1] (short) %v428_v26, 128 }
 0x197   : > { %3101 = vset.pattern.permute.xlu1 %v3297_v38 }
 0x198   : > { %3100 = vset.pattern.permute.xlu0 %v3297_v38 }
 0x1be   : > { %v693_v35 = vpop.trf.xlu0 }
 0x1bf   : > { %2976 = vmatprep.mubr.msk.bf16.mxu0 %vm817_vm3, %v693_v35  ;;  %v3639_v35 = vrot.slane %v3473_v20, %v815_v34 }
 0x1c2   : > { %v694_v39 = vpop.trf.xlu0  ;;  %v709_v40 = vpop.trf.xlu1 }
 0x1c3   : > { %2977 = vmatmul.mubr.msk.bf16.vlgmr.msra.gmra.mrb[0].mxu0 %vm817_vm3, %v694_v39 }
 0x1c4   : > { %2980 = vmatprep.mubr.msk.bf16.mxu0 %vm817_vm3, %v709_v40 }
 0x1c6   : > { %v710_v41 = vpop.trf.xlu1  ;;  %v725_v42 = vpop.trf.xlu0 }
 0x1ca   : > { %v726_v43 = vpop.trf.xlu0  ;;  %v741_v44 = vpop.trf.xlu1 }
 0x1cb   : > { %2981 = vmatmul.mubr.msk.bf16.gmra.mrb[4].mxu0 %vm817_vm3, %v710_v41 }
 0x1cc   : > { %2984 = vmatprep.mubr.msk.bf16.mxu0 %vm817_vm3, %v725_v42 }
 0x1ce   : > { %v757_v45 = vpop.trf.xlu0  ;;  %v742_v48 = vpop.trf.xlu1 }
 0x1d2   : > { %v758_v49 = vpop.trf.xlu0  ;;  %v773_v28 = vpop.trf.xlu1 }
 0x1d3   : > { %2985 = vmatmul.mubr.msk.bf16.gmra.mrb[8].mxu0 %vm817_vm3, %v726_v43 }
 0x1d4   : > { %2988 = vmatprep.mubr.msk.bf16.mxu0 %vm817_vm3, %v741_v44 }
 0x1d6   : > { %v789_v50 = vpop.trf.xlu0  ;;  %v774_v51 = vpop.trf.xlu1 }
 0x1da   : > { %v790_v52 = vpop.trf.xlu0  ;;  %v805_v53 = vpop.trf.xlu1 }
 0x1db   : > { %2989 = vmatmul.mubr.msk.bf16.gmra.mrb[12].mxu0 %vm817_vm3, %v742_v48 }
 0x1dc   : > { %2992 = vmatprep.mubr.msk.bf16.mxu0 %vm817_vm3, %v757_v45 }
 0x1de   : > { %v806_v58 = vpop.trf.xlu1 }
 0x1e3   : > { %2993 = vmatmul.mubr.msk.bf16.gmra.mrb[16].mxu0 %vm817_vm3, %v758_v49 }
 0x1e4   : > { %2996 = vmatprep.mubr.msk.bf16.mxu0 %vm817_vm3, %v773_v28 }
 0x1eb   : > { %2997 = vmatmul.mubr.msk.bf16.gmra.mrb[20].mxu0 %vm817_vm3, %v774_v51 }
 0x1ec   : > { %3000 = vmatprep.mubr.msk.bf16.mxu0 %vm817_vm3, %v789_v50 }
 0x1ef   : > { %v3507_v54 = vpop.trf.xlu0 }
 0x1f0   : > { %1193 = vperm.xlu0 %3100, %v3507_v54  }
 0x1f3   : > { %3001 = vmatmul.mubr.msk.bf16.gmra.mrb[24].mxu0 %vm817_vm3, %v790_v52  ;;  %v3511_v55 = vpop.trf.xlu0 }
 0x1f4   : > { %4305 = vst [vmem:[#allocation4_spill] sm:$0xff] %v3511_v55  ;;  %1198 = vperm.xlu1 %3101, %v3511_v55   ;;  %3004 = vmatprep.mubr.msk.bf16.mxu0 %vm817_vm3, %v805_v53 }
 0x1f7   : > { %v3515_v59 = vpop.trf.xlu0 }
 0x1f8   : > { %1203 = vperm.xlu1 %3101, %v3515_v59  }
 0x1f9   : > { %v3518_v60 = vpop.trf.xlu1 }
 0x1fb   : > { %3005 = vmatmul.mubr.msk.bf16.gmra.mrb[28].mxu0 %vm817_vm3, %v806_v58  ;;  %v3521_v61 = vpop.trf.xlu0 }
 0x1fc   : > { %4306 = vst [vmem:[#allocation5_spill] sm:$0xff] %v3521_v61  ;;  %1208 = vperm.xlu1 %3101, %v3521_v61  }
 0x1fd   : > { %v3524_v62 = vpop.trf.xlu1 }
 0x1ff   : > { %v3526_v63 = vpop.trf.xlu0 }
 0x200   : > { %4307 = vst [vmem:[#allocation6_spill] sm:$0xff] %v3526_v63  ;;  %3102 = vset.pattern.permute.xlu1 %v3298_v0 }
 0x201   : > { %1388 = vperm.xlu1 %3102, %v3511_v55   ;;  %v3530_v1 = vpop.trf.xlu1 }
 0x203   : > { %v3532_v36 = vpop.trf.xlu0 }
 0x204   : > { %4308 = vst [vmem:[#allocation7_spill] sm:$0xff] %v3532_v36  ;;  %1218 = vperm.xlu0 %3100, %v3532_v36  }
 0x205   : > { %1392 = vperm.xlu1 %3102, %v3515_v59   ;;  %v3536_v2 = vpop.trf.xlu1 }
 0x207   : > { %v3538_v3 = vpop.trf.xlu0 }
 0x208   : > { %4309 = vst [vmem:[#allocation8_spill] sm:$0xff] %v3538_v3 }
 0x209   : > { %3103 = vset.pattern.permute.xlu1 %v3297_v38  ;;  %v3541_v29 = vpop.trf.xlu1 }
 0x20a   : > { %1213 = vperm.xlu1 %3103, %v3526_v63  }
 0x20b   : > { %v3544_v4 = vpop.trf.xlu0 }
 0x20c   : > { %4310 = vst [vmem:[#allocation9_spill] sm:$0xff] %v3544_v4 }
 0x20d   : > { %v3546_v5 = vpop.trf.xlu1 }
 0x20e   : > { %1223 = vperm.xlu1 %3103, %v3538_v3  }
 0x20f   : > { %v453_v6 = vpop.trf.xlu0 }
 0x211   : > { %v3549_v7 = vpop.trf.xlu1 }
 0x212   : > { %1228 = vperm.xlu1 %3103, %v3544_v4  }
 0x213   : > { %v454_v8 = vpop.trf.xlu0 }
 0x214   : > { %1238 = vperm.xlu0 %3100, %v454_v8  }
 0x215   : > { %v3552_v37 = vpop.trf.xlu1 }
 0x216   : > { %3104 = vset.pattern.permute.xlu1 %v3298_v0 }
 0x217   : > { %1404 = vperm.xlu1 %3104, %v3532_v36   ;;  %v455_v9 = vpop.trf.xlu0 }
 0x219   : > { %v3556_v11 = vpop.trf.xlu1 }
 0x21b   : > { %1408 = vperm.xlu1 %3104, %v3538_v3   ;;  %v456_v46 = vpop.trf.xlu0 }
 0x21d   : > { %v3559_v12 = vpop.trf.xlu1 }
 0x21f   : > { %3105 = vset.pattern.permute.xlu1 %v3297_v38  ;;  %v457_v13 = vpop.trf.xlu0 }
 0x220   : > { %1233 = vperm.xlu1 %3105, %v453_v6  }
 0x221   : > { %v3562_v14 = vpop.trf.xlu1 }
 0x223   : > { %v458_v15 = vpop.trf.xlu0 }
 0x224   : > { %1243 = vperm.xlu1 %3105, %v455_v9   ;;  %1258 = vperm.xlu0 %3100, %v458_v15  }
 0x225   : > { %v3564_v16 = vpop.trf.xlu1 }
 0x227   : > { %v459_v19 = vpop.trf.xlu0 }
 0x228   : > { %1248 = vperm.xlu1 %3105, %v456_v46   ;;  %1278 = vperm.xlu0 %3100, %v3524_v62  }
 0x229   : > { %v3567_v17 = vpop.trf.xlu1 }
 0x22b   : > { %v460_v21 = vpop.trf.xlu0 }
 0x22c   : > { %3106 = vset.pattern.permute.xlu1 %v3298_v0  ;;  %1298 = vperm.xlu0 %3100, %v3546_v5  }
 0x22d   : > { %1420 = vperm.xlu1 %3106, %v454_v8   ;;  %v3572_v18 = vpop.trf.xlu1 }
 0x230   : > { %1318 = vperm.xlu0 %3100, %v3559_v12  }
 0x231   : > { %1424 = vperm.xlu1 %3106, %v455_v9   ;;  %v491_v56 = vpop.trf.xlu1 }
 0x234   : > { %1338 = vperm.xlu0 %3100, %v3572_v18  }
 0x235   : > { %3107 = vset.pattern.permute.xlu1 %v3297_v38  ;;  %v492_v23 = vpop.trf.xlu1 }
 0x236   : > { %1253 = vperm.xlu1 %3107, %v457_v13  }
 0x238   : > { %3116 = vset.pattern.permute.xlu0 %v3298_v0 }
 0x239   : > { %1384 = vperm.xlu0 %3116, %v3507_v54  }
 0x23a   : > { %1263 = vperm.xlu1 %3107, %v459_v19  }
 0x23d   : > { %1396 = vperm.xlu0 %3116, %v3521_v61  }
 0x23e   : > { %1268 = vperm.xlu1 %3107, %v460_v21  }
 0x241   : > { %1400 = vperm.xlu0 %3116, %v3526_v63  }
 0x242   : > { %3108 = vset.pattern.permute.xlu1 %v3298_v0 }
 0x243   : > { %1436 = vperm.xlu1 %3108, %v458_v15  }
 0x245   : > { %1412 = vperm.xlu0 %3116, %v3544_v4  }
 0x247   : > { %1440 = vperm.xlu1 %3108, %v459_v19  }
 0x249   : > { %1416 = vperm.xlu0 %3116, %v453_v6  }
 0x24b   : > { %3109 = vset.pattern.permute.xlu1 %v3297_v38 }
 0x24c   : > { %1273 = vperm.xlu1 %3109, %v3518_v60  }
 0x24d   : > { %1428 = vperm.xlu0 %3116, %v456_v46  }
 0x250   : > { %1283 = vperm.xlu1 %3109, %v3530_v1  }
 0x251   : > { %1432 = vperm.xlu0 %3116, %v457_v13  }
 0x254   : > { %1288 = vperm.xlu1 %3109, %v3536_v2  }
 0x255   : > { %1444 = vperm.xlu0 %3116, %v460_v21  }
 0x258   : > { %3110 = vset.pattern.permute.xlu1 %v3298_v0 }
 0x259   : > { %1448 = vperm.xlu0 %3116, %v3518_v60   ;;  %1452 = vperm.xlu1 %3110, %v3524_v62  }
 0x25d   : > { %1460 = vperm.xlu0 %3116, %v3536_v2   ;;  %1456 = vperm.xlu1 %3110, %v3530_v1  }
 0x261   : > { %1464 = vperm.xlu0 %3116, %v3541_v29   ;;  %3111 = vset.pattern.permute.xlu1 %v3297_v38 }
 0x262   : > { %1293 = vperm.xlu1 %3111, %v3541_v29  }
 0x265   : > { %1476 = vperm.xlu0 %3116, %v3552_v37  }
 0x266   : > { %1303 = vperm.xlu1 %3111, %v3549_v7  }
 0x269   : > { %1480 = vperm.xlu0 %3116, %v3556_v11  }
 0x26a   : > { %1308 = vperm.xlu1 %3111, %v3552_v37  }
 0x26d   : > { %1492 = vperm.xlu0 %3116, %v3564_v16  }
 0x26e   : > { %3112 = vset.pattern.permute.xlu1 %v3298_v0 }
 0x26f   : > { %1468 = vperm.xlu1 %3112, %v3546_v5   ;;  %v3636_v26 = vpop.permute.xlu0 %1193 }
 0x271   : > { %1496 = vperm.xlu0 %3116, %v3567_v17  }
 0x273   : > { %v3609_v24 = vpop.permute.xlu1 %1198  ;;  %1472 = vperm.xlu1 %3112, %v3549_v7  }
 0x275   : > { %1508 = vperm.xlu0 %3116, %v492_v23  }
 0x277   : > { %v3612_v25 = vpop.permute.xlu1 %1203  ;;  %3113 = vset.pattern.permute.xlu1 %v3297_v38 }
 0x278   : > { %1313 = vperm.xlu1 %3113, %v3556_v11  }
 0x27b   : > { %v3616_v27 = vpop.permute.xlu1 %1208 }
 0x27c   : > { %1323 = vperm.xlu1 %3113, %v3562_v14  }
 0x280   : > { %v3619_v30 = vpop.permute.xlu1 %1388  ;;  %1328 = vperm.xlu1 %3113, %v3564_v16  }
 0x283   : > { %v3643_v43 = vpop.permute.xlu0 %1218 }
 0x284   : > { %v3622_v31 = vpop.permute.xlu1 %1392  ;;  %3114 = vset.pattern.permute.xlu1 %v3298_v0 }
 0x285   : > { %1484 = vperm.xlu1 %3114, %v3559_v12  }
 0x289   : > { %v3626_v32 = vpop.permute.xlu1 %1213  ;;  %1488 = vperm.xlu1 %3114, %v3562_v14  }
 0x28d   : > { %v3629_v33 = vpop.permute.xlu1 %1223  ;;  %3115 = vset.pattern.permute.xlu1 %v3297_v38 }
 0x28e   : > { %1333 = vperm.xlu1 %3115, %v3567_v17  }
 0x291   : > { %v3633_v57 = vpop.permute.xlu1 %1228 }
 0x292   : > { %1343 = vperm.xlu1 %3115, %v491_v56  }
 0x293   : > { %v3652_v28 = vpop.permute.xlu0 %1238 }
 0x296   : > { %v2978_v39 = vpop.f32.mrb[0].mxu0  ;;  %v3641_v40 = vpop.permute.xlu1 %1404  ;;  %1348 = vperm.xlu1 %3115, %v492_v23  }
 0x297   : > { %v904_v41 = vpop.f32.mrb[1].mxu0  ;;  %v913_v44 = vadd.f32 %v2978_v39, %v3639_v35 }
 0x298   : > { %v2979_v42 = vpop.f32.mrb[2].mxu0  ;;  %v905_v20 = vadd.f32 %v904_v41, %v3639_v35 }
 0x299   : > { %v907_v38 = vpop.f32.mrb[3].mxu0  ;;  %v1065_v50 = vmul.f32 0.70710677, %v913_v44  ;;  %v3655_v51 = vadd.f32 %v2979_v42, %v3639_v35 }
 0x29a   : > { %v908_v45 = vadd.f32 %v907_v38, %v3639_v35  ;;  %v3647_v48 = vpop.permute.xlu1 %1408  ;;  %3117 = vset.pattern.permute.xlu1 %v3298_v0  ;;  %v1063_v53 = vmul.f32 0.70710677, %v905_v20 }
 0x29b   : > { %1500 = vperm.xlu1 %3117, %v3572_v18   ;;  %v1066_v1 = vmul.f32 0.70710677, %v3655_v51 }
 0x29c   : > { %v1064_v49 = vmul.f32 0.70710677, %v908_v45  ;;  %v1032_v41 = vmul.f32 0.5, %v908_v45 }
 0x29e   : > { %v2982_v52 = vpop.f32.mrb[4].mxu0  ;;  %3152 = verf.f32 %v1064_v49 }
 0x29f   : > { %v920_v58 = vpop.f32.mrb[5].mxu0  ;;  %v3657_v60 = vpop.permute.xlu1 %1233  ;;  %1504 = vperm.xlu1 %3117, %v491_v56   ;;  %3154 = verf.f32 %v1065_v50  ;;  %v3664_v29 = vadd.f32 %v2982_v52, %v3639_v35  ;;  %v1033_v50 = vmul.f32 0.5, %v913_v44 }
 0x2a0   : > { %v2983_v62 = vpop.f32.mrb[6].mxu0  ;;  %3156 = verf.f32 %v1063_v53  ;;  %v3671_v7 = vadd.f32 %v920_v58, %v3639_v35 }
 0x2a1   : > { %v923_v0 = vpop.f32.mrb[7].mxu0  ;;  %3158 = verf.f32 %v1066_v1  ;;  %v1069_v9 = vmul.f32 0.70710677, %v3664_v29  ;;  %v3676_v11 = vadd.f32 %v2983_v62, %v3639_v35  ;;  %v1031_v62 = vmul.f32 0.5, %v905_v20 }
 0x2a2   : > { %v3661_v2 = vadd.f32 %v923_v0, %v3639_v35  ;;  %v1067_v13 = vmul.f32 0.70710677, %v3671_v7 }
 0x2a3   : > { %v3666_v5 = vpop.permute.xlu1 %1243  ;;  %v3668_v6 = vpop.permute.xlu0 %1258  ;;  %v1070_v47 = vmul.f32 0.70710677, %v3676_v11 }
 0x2a4   : > { %v1068_v8 = vmul.f32 0.70710677, %v3661_v2 }
 0x2a6   : > { %v2986_v37 = vpop.f32.mrb[8].mxu0  ;;  %3160 = verf.f32 %v1068_v8 }
 0x2a7   : > { %v936_v46 = vpop.f32.mrb[9].mxu0  ;;  %v3678_v12 = vpop.permute.xlu1 %1248  ;;  %v3684_v16 = vadd.f32 %v2986_v37, %v3639_v35  ;;  %3162 = verf.f32 %v1069_v9 }
 0x2a8   : > { %v2987_v14 = vpop.f32.mrb[10].mxu0  ;;  %v3681_v15 = vpop.permute.xlu0 %1278  ;;  %3164 = verf.f32 %v1067_v13  ;;  %v3691_v22 = vadd.f32 %v936_v46, %v3639_v35 }
 0x2a9   : > { %v939_v17 = vpop.f32.mrb[11].mxu0  ;;  %v3153_v19 = vpop.eup %3152  ;;  %v1073_v39 = vmul.f32 0.70710677, %v3684_v16  ;;  %3166 = verf.f32 %v1070_v47  ;;  %v3701_v8 = vadd.f32 %v2987_v14, %v3639_v35  ;;  %v1034_v14 = vmul.f32 0.5, %v3655_v51 }
 0x2aa   : > { %v3687_v18 = vadd.f32 %v939_v17, %v3639_v35  ;;  %v3155_v21 = vpop.eup %3154  ;;  %v1128_v42 = vadd.f32 1.0, %v3153_v19  ;;  %v1071_v1 = vmul.f32 0.70710677, %v3691_v22  ;;  %v1036_v51 = vmul.f32 0.5, %v3661_v2 }
 0x2ab   : > { %v3157_v34 = vpop.eup %3156  ;;  %v1129_v52 = vadd.f32 1.0, %v3155_v21  ;;  %3168 = verf.f32 %v1073_v39  ;;  %v1074_v21 = vmul.f32 0.70710677, %v3701_v8 }
 0x2ac   : > { %v3693_v56 = vpop.permute.xlu1 %1420  ;;  %v3695_v23 = vpop.permute.xlu0 %1298  ;;  %v1072_v38 = vmul.f32 0.70710677, %v3687_v18  ;;  %v1127_v0 = vadd.f32 1.0, %v3157_v34  ;;  %v1160_v13 = vmul.f32 %v1128_v42, %v1032_v41 }
 0x2ad   : > { %v3159_v58 = vpop.eup %3158  ;;  %v1161_v19 = vmul.f32 %v1129_v52, %v1033_v50 }
 0x2ae   : > { %v2990_v49 = vpop.f32.mrb[12].mxu0  ;;  %3170 = verf.f32 %v1072_v38  ;;  %v1130_v47 = vadd.f32 1.0, %v3159_v58  ;;  %v1159_v39 = vmul.f32 %v1127_v0, %v1031_v62  ;;  %v1037_v62 = vmul.f32 0.5, %v3664_v29 }
 0x2af   : > { %v952_v53 = vpop.f32.mrb[13].mxu0  ;;  %3172 = verf.f32 %v1071_v1  ;;  %v3716_v34 = vadd.f32 %v2990_v49, %v3639_v35  ;;  %v1352_v49 = vmul.f32 %v3609_v24, %v1160_v13  ;;  %v1035_v0 = vmul.f32 0.5, %v3671_v7 }
 0x2b0   : > { %v2991_v37 = vpop.f32.mrb[14].mxu0  ;;  %v3703_v9 = vpop.permute.xlu1 %1424  ;;  %v3708_v44 = vadd.f32 %v952_v53, %v3639_v35  ;;  %v1162_v10 = vmul.f32 %v1130_v47, %v1034_v14  ;;  %3174 = verf.f32 %v1074_v21  ;;  %v1351_v3 = vmul.f32 %v3636_v26, %v1159_v39 }
 0x2b1   : > { %v3705_v45 = vpop.permute.xlu0 %1318  ;;  %v955_v46 = vpop.f32.mrb[15].mxu0  ;;  %v3719_v42 = vadd.f32 %v2991_v37, %v3639_v35  ;;  %v1077_v4 = vmul.f32 0.70710677, %v3716_v34  ;;  %v1353_v2 = vmul.f32 %v3612_v25, %v1161_v19  ;;  %v1512_v47 = vadd.f32 %v3619_v30, %v1352_v49 }
 0x2b2   : > { %v3711_v20 = vadd.f32 %v955_v46, %v3639_v35  ;;  %v3161_v17 = vpop.eup %3160  ;;  %v1075_v58 = vmul.f32 0.70710677, %v3708_v44  ;;  %v1038_v26 = vmul.f32 0.5, %v3676_v11  ;;  %v1354_v19 = vmul.f32 %v3616_v27, %v1162_v10 }
 0x2b3   : > { %v3163_v41 = vpop.eup %3162  ;;  %v1132_v52 = vadd.f32 1.0, %v3161_v17  ;;  %v1078_v61 = vmul.f32 0.70710677, %v3719_v42 }
 0x2b4   : > { %v1076_v38 = vmul.f32 0.70710677, %v3711_v20  ;;  %v3165_v50 = vpop.eup %3164  ;;  %v1133_v63 = vadd.f32 1.0, %v3163_v41 }
 0x2b5   : > { %v3722_v53 = vpop.permute.xlu0 %1338  ;;  %v3724_v46 = vpop.permute.xlu1 %1253  ;;  %v1131_v55 = vadd.f32 1.0, %v3165_v50  ;;  %v1164_v13 = vmul.f32 %v1132_v52, %v1036_v51  ;;  %v1513_v51 = vadd.f32 %v3622_v31, %v1353_v2  ;;  %v1041_v31 = vmul.f32 0.5, %v3684_v16 }
 0x2b6   : > { %v2994_v1 = vpop.f32.mrb[16].mxu0  ;;  %v3167_v17 = vpop.eup %3166  ;;  %3176 = verf.f32 %v1076_v38 }
 0x2b7   : > { %v968_v37 = vpop.f32.mrb[17].mxu0  ;;  %3178 = verf.f32 %v1075_v58  ;;  %v3169_v21 = vpop.eup %3168  ;;  %v1134_v41 = vadd.f32 1.0, %v3167_v17  ;;  %v1163_v52 = vmul.f32 %v1131_v55, %v1035_v0 }
 0x2b8   : > { %v2995_v36 = vpop.f32.mrb[18].mxu0  ;;  %v3740_v25 = vadd.f32 %v968_v37, %v3639_v35  ;;  %v3171_v39 = vpop.eup %3170  ;;  %3180 = verf.f32 %v1077_v4  ;;  %v1137_v11 = vadd.f32 1.0, %v3169_v21  ;;  %v1356_v4 = vmul.f32 %v3643_v43, %v1164_v13 }
 0x2b9   : > { %v1385_v24 = vpop.permute.xlu0 %1384  ;;  %v971_v29 = vpop.f32.mrb[19].mxu0  ;;  %3182 = verf.f32 %v1078_v61  ;;  %v1136_v27 = vadd.f32 1.0, %v3171_v39  ;;  %v3755_v61 = vadd.f32 %v2994_v1, %v3639_v35  ;;  %v1166_v17 = vmul.f32 %v1134_v41, %v1038_v26 }
 0x2ba   : > { %v1511_v7 = vadd.f32 %v1385_v24, %v1351_v3  ;;  %v3735_v14 = vpop.permute.xlu1 %1263  ;;  %v3744_v38 = vadd.f32 %v971_v29, %v3639_v35  ;;  %v1165_v3 = vmul.f32 %v1133_v63, %v1037_v62  ;;  %v3173_v58 = vpop.eup %3172  ;;  %v1079_v63 = vmul.f32 0.70710677, %v3740_v25 }
 0x2bb   : > { %v3762_v62 = vadd.f32 %v2995_v36, %v3639_v35  ;;  %v1039_v29 = vmul.f32 0.5, %v3691_v22  ;;  %v1135_v43 = vadd.f32 1.0, %v3173_v58  ;;  %v1040_v13 = vmul.f32 0.5, %v3687_v18  ;;  %v3175_v21 = vpop.eup %3174 }
 0x2bc   : > { %v1543_v50 = vpack.c.bf16 %v1512_v47, %v1511_v7  ;;  %v1080_v49 = vmul.f32 0.70710677, %v3744_v38  ;;  %v1355_v1 = vmul.f32 %v3626_v32, %v1163_v52  ;;  %v1516_v36 = vadd.f32 %v3641_v40, %v1356_v4 }
 0x2bd   : > { %v1397_v30 = vpop.permute.xlu0 %1396  ;;  %v1357_v26 = vmul.f32 %v3629_v33, %v1165_v3  ;;  %v1168_v39 = vmul.f32 %v1136_v27, %v1040_v13  ;;  %v1081_v18 = vmul.f32 0.70710677, %v3755_v61  ;;  %v1358_v40 = vmul.f32 %v3633_v57, %v1166_v17 }
 0x2be   : > { %v1514_v37 = vadd.f32 %v1397_v30, %v1354_v19  ;;  %v3748_v24 = vpop.permute.xlu1 %1268  ;;  %3012 = vmatprep.mubr.msk.bf16.mxu1 %vm523_vm1, %v1543_v50  ;;  %v3751_v10 = vpop.f32.mrb[20].mxu0  ;;  %v1169_v19 = vmul.f32 %v1137_v11, %v1041_v31  ;;  %3184 = verf.f32 %v1080_v49  ;;  %v1042_v50 = vmul.f32 0.5, %v3701_v8 }
 0x2bf   : > { %v3758_v55 = vpop.f32.mrb[21].mxu0  ;;  %3186 = verf.f32 %v1079_v63  ;;  %v1082_v30 = vmul.f32 0.70710677, %v3762_v62  ;;  %v1138_v52 = vadd.f32 1.0, %v3175_v21  ;;  %v1043_v58 = vmul.f32 0.5, %v3708_v44 }
 0x2c0   : > { %v1544_v0 = vpack.c.bf16 %v1514_v37, %v1513_v51  ;;  %v3764_v2 = vpop.f32.mrb[22].mxu0  ;;  %v3177_v22 = vpop.eup %3176  ;;  %v1045_v51 = vmul.f32 0.5, %v3716_v34  ;;  %v1167_v3 = vmul.f32 %v1135_v43, %v1039_v29  ;;  %v1044_v37 = vmul.f32 0.5, %v3711_v20 }
 0x2c1   : > { %v1401_v7 = vpop.permute.xlu0 %1400  ;;  %v3769_v47 = vpop.f32.mrb[23].mxu0  ;;  %v1140_v4 = vadd.f32 1.0, %v3177_v22  ;;  %v1517_v27 = vadd.f32 %v3647_v48, %v1357_v26  ;;  %v1361_v57 = vmul.f32 %v3666_v5, %v1169_v19  ;;  %3188 = verf.f32 %v1081_v18 }
 0x2c2   : > { %3013 = vmatmul.mubr.msk.bf16.vlgmr.msra.gmra.mrb[0].mxu1 %vm523_vm1, %v1544_v0  ;;  %v3773_v16 = vpop.permute.xlu1 %1436  ;;  %v1515_v32 = vadd.f32 %v1401_v7, %v1355_v1  ;;  %v3179_v41 = vpop.eup %3178  ;;  %v1360_v0 = vmul.f32 %v3652_v28, %v1168_v39  ;;  %3190 = verf.f32 %v1082_v30  ;;  %v1359_v28 = vmul.f32 %v3657_v60, %v1167_v3 }
 0x2c3   : > { %v3181_v49 = vpop.eup %3180  ;;  %v1139_v17 = vadd.f32 1.0, %v3179_v41  ;;  %v1170_v21 = vmul.f32 %v1138_v52, %v1042_v50  ;;  %v1046_v19 = vmul.f32 0.5, %v3719_v42  ;;  %v1047_v30 = vmul.f32 0.5, %v3740_v25 }
 0x2c4   : > { %v1545_v11 = vpack.c.bf16 %v1516_v36, %v1515_v32  ;;  %v3183_v34 = vpop.eup %3182  ;;  %v1141_v13 = vadd.f32 1.0, %v3181_v49  ;;  %v1172_v36 = vmul.f32 %v1140_v4, %v1044_v37  ;;  %v1520_v22 = vadd.f32 %v3693_v56, %v1360_v0 }
 0x2c5   : > { %v1413_v33 = vpop.permute.xlu0 %1412  ;;  %v1142_v26 = vadd.f32 1.0, %v3183_v34  ;;  %v1171_v39 = vmul.f32 %v1139_v17, %v1043_v58  ;;  %v1521_v50 = vadd.f32 %v3703_v9, %v1361_v57  ;;  %v3812_v56 = vadd.f32 %v3758_v55, %v3639_v35 }
 0x2c6   : > { %v1518_v63 = vadd.f32 %v1413_v33, %v1358_v40  ;;  %v3002_v8 = vpop.f32.mrb[24].mxu0  ;;  %v3784_v31 = vpop.permute.xlu1 %1440  ;;  %3016 = vmatprep.mubr.msk.bf16.mxu1 %vm523_vm1, %v1545_v11  ;;  %v1173_v42 = vmul.f32 %v1141_v13, %v1045_v51  ;;  %v1362_v11 = vmul.f32 %v3678_v12, %v1170_v21  ;;  %v1364_v58 = vmul.f32 %v3668_v6, %v1172_v36 }
 0x2c7   : > { %v1000_v44 = vpop.f32.mrb[25].mxu0  ;;  %v3790_v20 = vadd.f32 %v3002_v8, %v3639_v35  ;;  %v1174_v3 = vmul.f32 %v1142_v26, %v1046_v19  ;;  %v1363_v37 = vmul.f32 %v3724_v46, %v1171_v39  ;;  %v3823_v55 = vadd.f32 %v3769_v47, %v3639_v35 }
 0x2c8   : > { %v1546_v29 = vpack.c.bf16 %v1518_v63, %v1517_v27  ;;  %v3793_v48 = vadd.f32 %v1000_v44, %v3639_v35  ;;  %v3003_v43 = vpop.f32.mrb[26].mxu0  ;;  %v3185_v41 = vpop.eup %3184  ;;  %v1048_v34 = vmul.f32 0.5, %v3744_v38  ;;  %v3831_v0 = vadd.f32 %v3764_v2, %v3639_v35 }
 0x2c9   : > { %v3796_v1 = vadd.f32 %v3003_v43, %v3639_v35  ;;  %v1417_v5 = vpop.permute.xlu0 %1416  ;;  %v1003_v7 = vpop.f32.mrb[27].mxu0  ;;  %v1144_v4 = vadd.f32 1.0, %v3185_v41  ;;  %v1083_v43 = vmul.f32 0.70710677, %v3812_v56  ;;  %v1524_v13 = vadd.f32 %v3773_v16, %v1364_v58 }
 0x2ca   : > { %3017 = vmatmul.mubr.msk.bf16.gmra.mrb[4].mxu1 %vm523_vm1, %v1546_v29  ;;  %v1519_v18 = vadd.f32 %v1417_v5, %v1359_v28  ;;  %v3806_v60 = vadd.f32 %v1003_v7, %v3639_v35  ;;  %v3187_v40 = vpop.eup %3186  ;;  %v1365_v38 = vmul.f32 %v3735_v14, %v1173_v42  ;;  %v3842_v2 = vadd.f32 %v3751_v10, %v3639_v35 }
 0x2cb   : > { %v3802_v32 = vpop.permute.xlu1 %1273  ;;  %v1143_v6 = vadd.f32 1.0, %v3187_v40  ;;  %v3189_v46 = vpop.eup %3188  ;;  %v1176_v7 = vmul.f32 %v1144_v4, %v1048_v34  ;;  %v1366_v19 = vmul.f32 %v3748_v24, %v1174_v3  ;;  %v1084_v36 = vmul.f32 0.70710677, %v3823_v55 }
 0x2cc   : > { %v1547_v52 = vpack.c.bf16 %v1520_v22, %v1519_v18  ;;  %v1088_v25 = vmul.f32 0.70710677, %v3806_v60  ;;  %v3191_v29 = vpop.eup %3190  ;;  %v1086_v16 = vmul.f32 0.70710677, %v3831_v0  ;;  %v1145_v39 = vadd.f32 1.0, %v3189_v46 }
 0x2cd   : > { %v1429_v33 = vpop.permute.xlu0 %1428  ;;  %v1175_v26 = vmul.f32 %v1143_v6, %v1047_v30  ;;  %v1525_v14 = vadd.f32 %v3784_v31, %v1365_v38  ;;  %v1146_v40 = vadd.f32 1.0, %v3191_v29  ;;  %v1049_v10 = vmul.f32 0.5, %v3755_v61 }
 0x2ce   : > { %v3006_v49 = vpop.f32.mrb[28].mxu0  ;;  %v1522_v27 = vadd.f32 %v1429_v33, %v1362_v11  ;;  %3020 = vmatprep.mubr.msk.bf16.mxu1 %vm523_vm1, %v1547_v52  ;;  %3192 = verf.f32 %v1088_v25  ;;  %v1050_v24 = vmul.f32 0.5, %v3762_v62  ;;  %v1368_v30 = vmul.f32 %v3681_v15, %v1176_v7 }
 0x2cf   : > { %v3819_v9 = vadd.f32 %v3006_v49, %v3639_v35  ;;  %v1016_v12 = vpop.f32.mrb[29].mxu0  ;;  %v1284_v51 = vpop.permute.xlu1 %1283  ;;  %3194 = verf.f32 %v1083_v43  ;;  %v1367_v42 = vmul.f32 %v3802_v32, %v1175_v26  ;;  %v1177_v33 = vmul.f32 %v1145_v39, %v1049_v10 }
 0x2d0   : > { %v3826_v63 = vadd.f32 %v1016_v12, %v3639_v35  ;;  %v3007_v8 = vpop.f32.mrb[30].mxu0  ;;  %v1548_v57 = vpack.c.bf16 %v1522_v27, %v1521_v50  ;;  %v1085_v50 = vmul.f32 0.70710677, %v3842_v2  ;;  %v1178_v25 = vmul.f32 %v1146_v40, %v1050_v24 }
 0x2d1   : > { %v3834_v17 = vadd.f32 %v3007_v8, %v3639_v35  ;;  %v1433_v44 = vpop.permute.xlu0 %1432  ;;  %v1019_v47 = vpop.f32.mrb[31].mxu0  ;;  %v1056_v61 = vmul.f32 0.5, %v3806_v60  ;;  %v1051_v43 = vmul.f32 0.5, %v3812_v56  ;;  %v1052_v38 = vmul.f32 0.5, %v3823_v55 }
 0x2d2   : > { %v1523_v28 = vadd.f32 %v1433_v44, %v1363_v37  ;;  %v1020_v5 = vadd.f32 %v1019_v47, %v3639_v35  ;;  %3021 = vmatmul.mubr.msk.bf16.gmra.mrb[8].mxu1 %vm523_vm1, %v1548_v57  ;;  %v1369_v37 = vmul.f32 %v1284_v51, %v1177_v33 }
 0x2d3   : > { %v1289_v21 = vpop.permute.xlu1 %1288 }
 0x2d4   : > { %v1549_v22 = vpack.c.bf16 %v1524_v13, %v1523_v28  ;;  %v1092_v18 = vmul.f32 0.70710677, %v1020_v5  ;;  %v1370_v15 = vmul.f32 %v1289_v21, %v1178_v25  ;;  %v1060_v57 = vmul.f32 0.5, %v1020_v5 }
 0x2d5   : > { %v1445_v41 = vpop.permute.xlu0 %1444  ;;  %v1054_v5 = vmul.f32 0.5, %v3831_v0 }
 0x2d6   : > { %v1526_v35 = vadd.f32 %v1445_v41, %v1366_v19  ;;  %3024 = vmatprep.mubr.msk.bf16.mxu1 %vm523_vm1, %v1549_v22  ;;  %3196 = verf.f32 %v1092_v18  ;;  %v1087_v41 = vmul.f32 0.70710677, %v3793_v48 }
 0x2d7   : > { %3198 = verf.f32 %v1084_v36 }
 0x2d8   : > { %v1550_v52 = vpack.c.bf16 %v1526_v35, %v1525_v14  ;;  %v1453_v11 = vpop.permute.xlu1 %1452  ;;  %v3193_v58 = vpop.eup %3192  ;;  %3200 = verf.f32 %v1086_v16  ;;  %v1053_v16 = vmul.f32 0.5, %v3842_v2  ;;  %v1089_v2 = vmul.f32 0.70710677, %v3790_v20 }
 0x2d9   : > { %v1528_v31 = vadd.f32 %v1453_v11, %v1368_v30  ;;  %v1449_v3 = vpop.permute.xlu0 %1448  ;;  %v1152_v62 = vadd.f32 1.0, %v3193_v58  ;;  %3202 = verf.f32 %v1085_v50  ;;  %v3195_v34 = vpop.eup %3194 }
 0x2da   : > { %v1527_v49 = vadd.f32 %v1449_v3, %v1367_v42  ;;  %3025 = vmatmul.mubr.msk.bf16.gmra.mrb[12].mxu1 %vm523_vm1, %v1550_v52  ;;  %v1147_v13 = vadd.f32 1.0, %v3195_v34  ;;  %3204 = verf.f32 %v1087_v41 }
 0x2db   : > { %v1184_v6 = vmul.f32 %v1152_v62, %v1056_v61 }
 0x2dc   : > { %v1551_v4 = vpack.c.bf16 %v1528_v31, %v1527_v49  ;;  %v1457_v27 = vpop.permute.xlu1 %1456  ;;  %v1179_v26 = vmul.f32 %v1147_v13, %v1051_v43 }
 0x2dd   : > { %v1529_v32 = vadd.f32 %v1457_v27, %v1369_v37  ;;  %v1461_v12 = vpop.permute.xlu0 %1460  ;;  %v3859_v46 = vmul.f32 %v3705_v45, %v1184_v6  ;;  %v1055_v37 = vmul.f32 0.5, %v3793_v48  ;;  %v1058_v6 = vmul.f32 0.5, %v3796_v1 }
 0x2de   : > { %v1530_v8 = vadd.f32 %v1461_v12, %v1370_v15  ;;  %3028 = vmatprep.mubr.msk.bf16.mxu1 %vm523_vm1, %v1551_v4  ;;  %v1091_v12 = vmul.f32 0.70710677, %v3826_v63 }
 0x2e0   : > { %v1552_v60 = vpack.c.bf16 %v1530_v8, %v1529_v32  ;;  %v3197_v44 = vpop.eup %3196 }
 0x2e1   : > { %v1294_v51 = vpop.permute.xlu1 %1293  ;;  %v3199_v47 = vpop.eup %3198  ;;  %v1156_v29 = vadd.f32 1.0, %v3197_v44 }
 0x2e2   : > { %3029 = vmatmul.mubr.msk.bf16.gmra.mrb[16].mxu1 %vm523_vm1, %v1552_v60  ;;  %v3201_v28 = vpop.eup %3200  ;;  %v1148_v21 = vadd.f32 1.0, %v3199_v47  ;;  %v1371_v14 = vmul.f32 %v1294_v51, %v1179_v26  ;;  %v1465_v55 = vpop.permute.xlu0 %1464  ;;  %v1057_v60 = vmul.f32 0.5, %v3790_v20  ;;  %v1094_v51 = vmul.f32 0.70710677, %v3834_v17 }
 0x2e3   : > { %v1188_v7 = vmul.f32 %v1156_v29, %v1060_v57  ;;  %v3203_v45 = vpop.eup %3202  ;;  %v1150_v22 = vadd.f32 1.0, %v3201_v28  ;;  %v1093_v28 = vmul.f32 0.70710677, %v3819_v9 }
 0x2e4   : > { %v1149_v56 = vadd.f32 1.0, %v3203_v45  ;;  %v1180_v18 = vmul.f32 %v1148_v21, %v1052_v38  ;;  %v1531_v0 = vadd.f32 %v1465_v55, %v1371_v14  ;;  %v3205_v25 = vpop.eup %3204  ;;  %v1061_v55 = vmul.f32 0.5, %v3819_v9 }
 0x2e5   : > { %v1304_v19 = vpop.permute.xlu1 %1303  ;;  %v3865_v36 = vmul.f32 %v3722_v53, %v1188_v7  ;;  %v1182_v40 = vmul.f32 %v1150_v22, %v1054_v5  ;;  %v1090_v53 = vmul.f32 0.70710677, %v3796_v1  ;;  %v1151_v49 = vadd.f32 1.0, %v3205_v25 }
 0x2e6   : > { %v1181_v35 = vmul.f32 %v1149_v56, %v1053_v16  ;;  %v1372_v10 = vmul.f32 %v3695_v23, %v1180_v18  ;;  %v1477_v11 = vpop.permute.xlu0 %1476  ;;  %v1059_v22 = vmul.f32 0.5, %v3826_v63  ;;  %v1062_v18 = vmul.f32 0.5, %v3834_v17 }
 0x2e7   : > { %3206 = verf.f32 %v1090_v53  ;;  %v1183_v4 = vmul.f32 %v1151_v49, %v1055_v37 }
 0x2e8   : > { %v1373_v42 = vmul.f32 %v1304_v19, %v1181_v35  ;;  %3208 = verf.f32 %v1089_v2 }
 0x2e9   : > { %v1309_v39 = vpop.permute.xlu1 %1308  ;;  %3210 = verf.f32 %v1091_v12 }
 0x2ea   : > { %v1374_v30 = vmul.f32 %v1309_v39, %v1182_v40  ;;  %v1481_v57 = vpop.permute.xlu0 %1480  ;;  %3212 = verf.f32 %v1094_v51 }
 0x2eb   : > { %3214 = verf.f32 %v1093_v28 }
 0x2ec   : > { %v1534_v31 = vadd.f32 %v1477_v11, %v1374_v30 }
 0x2ee   : > { %v1469_v24 = vpop.permute.xlu1 %1468  ;;  %v1493_v1 = vpop.permute.xlu0 %1492 }
 0x2ef   : > { %v1532_v50 = vadd.f32 %v1469_v24, %v1372_v10 }
 0x2f1   : > { %v1553_v52 = vpack.c.bf16 %v1532_v50, %v1531_v0  ;;  %v3207_v62 = vpop.eup %3206 }
 0x2f2   : > { %v1473_v33 = vpop.permute.xlu1 %1472  ;;  %v3209_v15 = vpop.eup %3208  ;;  %v1154_v27 = vadd.f32 1.0, %v3207_v62 }
 0x2f3   : > { %v1533_v3 = vadd.f32 %v1473_v33, %v1373_v42  ;;  %3032 = vmatprep.mubr.msk.bf16.mxu1 %vm523_vm1, %v1553_v52  ;;  %v1153_v34 = vadd.f32 1.0, %v3209_v15  ;;  %v3211_v26 = vpop.eup %3210  ;;  %v1497_v53 = vpop.permute.xlu0 %1496 }
 0x2f4   : > { %v1186_v44 = vmul.f32 %v1154_v27, %v1058_v6  ;;  %v3213_v56 = vpop.eup %3212 }
 0x2f5   : > { %v1554_v23 = vpack.c.bf16 %v1534_v31, %v1533_v3  ;;  %v1185_v48 = vmul.f32 %v1153_v34, %v1057_v60  ;;  %v3215_v39 = vpop.eup %3214  ;;  %v1158_v14 = vadd.f32 1.0, %v3213_v56  ;;  %v3895_v3 = vld [vmem:[%s390_s17] ss:$0 sm:$0xff] }
 0x2f6   : > { %v1157_v10 = vadd.f32 1.0, %v3215_v39 }
 0x2f7   : > { %v1314_v58 = vpop.permute.xlu1 %1313  ;;  %3033 = vmatmul.mubr.msk.bf16.gmra.mrb[20].mxu1 %vm523_vm1, %v1554_v23  ;;  %v1190_v24 = vmul.f32 %v1158_v14, %v1062_v18  ;;  %v1509_v11 = vpop.permute.xlu0 %1508 }
 0x2f8   : > { %v1375_v8 = vmul.f32 %v1314_v58, %v1183_v4  ;;  %v1189_v50 = vmul.f32 %v1157_v10, %v1061_v55 }
 0x2fa   : > { %v1535_v29 = vadd.f32 %v1481_v57, %v1375_v8 }
 0x2fb   : > { %v1324_v61 = vpop.permute.xlu1 %1323 }
 0x2fc   : > { %v1377_v7 = vmul.f32 %v1324_v61, %v1185_v48 }
 0x2ff   : > { %v1329_v32 = vpop.permute.xlu1 %1328 }
 0x300   : > { %v1378_v43 = vmul.f32 %v1329_v32, %v1186_v44 }
 0x302   : > { %v1538_v19 = vadd.f32 %v1493_v1, %v1378_v43 }
 0x304   : > { %v1485_v47 = vpop.permute.xlu1 %1484 }
 0x305   : > { %v1536_v13 = vadd.f32 %v1485_v47, %v3859_v46  ;;  %v1155_v46 = vadd.f32 1.0, %v3211_v26 }
 0x307   : > { %v1555_v38 = vpack.c.bf16 %v1536_v13, %v1535_v29  ;;  %v1187_v41 = vmul.f32 %v1155_v46, %v1059_v22 }
 0x308   : > { %v1489_v21 = vpop.permute.xlu1 %1488 }
 0x309   : > { %v1537_v45 = vadd.f32 %v1489_v21, %v1377_v7  ;;  %3036 = vmatprep.mubr.msk.bf16.mxu1 %vm523_vm1, %v1555_v38 }
 0x30b   : > { %v1556_v20 = vpack.c.bf16 %v1538_v19, %v1537_v45 }
 0x30d   : > { %v1334_v5 = vpop.permute.xlu1 %1333  ;;  %3037 = vmatmul.mubr.msk.bf16.gmra.mrb[24].mxu1 %vm523_vm1, %v1556_v20 }
 0x30e   : > { %v1379_v35 = vmul.f32 %v1334_v5, %v1187_v41 }
 0x310   : > { %v1539_v30 = vadd.f32 %v1497_v53, %v1379_v35 }
 0x311   : > { %v1344_v16 = vpop.permute.xlu1 %1343 }
 0x312   : > { %v1381_v42 = vmul.f32 %v1344_v16, %v1189_v50 }
 0x315   : > { %v1349_v40 = vpop.permute.xlu1 %1348 }
 0x316   : > { %v1382_v63 = vmul.f32 %v1349_v40, %v1190_v24 }
 0x318   : > { %v1542_v33 = vadd.f32 %v1509_v11, %v1382_v63 }
 0x31a   : > { %v1501_v0 = vpop.permute.xlu1 %1500 }
 0x31b   : > { %v1540_v2 = vadd.f32 %v1501_v0, %v3865_v36 }
 0x31d   : > { %v1557_v52 = vpack.c.bf16 %v1540_v2, %v1539_v30 }
 0x31e   : > { %v1505_v17 = vpop.permute.xlu1 %1504 }
 0x31f   : > { %v1541_v31 = vadd.f32 %v1505_v17, %v1381_v42  ;;  %3040 = vmatprep.mubr.msk.bf16.mxu1 %vm523_vm1, %v1557_v52 }
 0x321   : > { %v1558_v9 = vpack.c.bf16 %v1542_v33, %v1541_v31 }
 0x323   : > { %3041 = vmatmul.mubr.msk.bf16.gmra.mrb[28].mxu1 %vm523_vm1, %v1558_v9 }
 0x395   : > { %v3014_v23 = vpop.f32.mrb[0].mxu1 }
 0x396   : > { %v1659_v58 = vpop.f32.mrb[1].mxu1  ;;  %v1668_v15 = vadd.f32 %v3014_v23, %v3895_v3 }
 0x397   : > { %v1660_v36 = vadd.f32 %v3895_v3, %v1659_v58  ;;  %v3015_v25 = vpop.f32.mrb[2].mxu1 }
 0x398   : > { %v1662_v49 = vpop.f32.mrb[3].mxu1  ;;  %v1671_v12 = vadd.f32 %v3015_v25, %v3895_v3 }
 0x399   : > { %1786 = vxpose.xlu1.b32.start [1/4] (short) (narrow) %v1660_v36, 8  ;;  %v1663_v61 = vadd.f32 %v3895_v3, %v1662_v49  ;;  %v3299_v49 = vmov 2  }
 0x39d   : > { %1787 = vxpose.xlu1.b32.cont [2/4] (short) (narrow) %v1663_v61, 8  ;;  %v3018_v62 = vpop.f32.mrb[4].mxu1  ;;  %v3248_v61 = vld [vmem:[#allocation2] sm:$0xff] }
 0x39e   : > { %v1675_v37 = vpop.f32.mrb[5].mxu1  ;;  %v1684_v34 = vadd.f32 %v3018_v62, %v3895_v3 }
 0x39f   : > { %v1676_v4 = vadd.f32 %v3895_v3, %v1675_v37  ;;  %v3019_v27 = vpop.f32.mrb[6].mxu1 }
 0x3a0   : > { %v1678_v32 = vpop.f32.mrb[7].mxu1  ;;  %v1687_v51 = vadd.f32 %v3019_v27, %v3895_v3 }
 0x3a1   : > { %1788 = vxpose.xlu1.b32.cont [3/4] (short) (narrow) %v1668_v15, 8  ;;  %1818 = vxpose.xlu0.b32.start [1/4] (short) (narrow) %v1676_v4, 8  ;;  %v1679_v6 = vadd.f32 %v3895_v3, %v1678_v32  ;;  %v3249_v15 = vld [vmem:[#allocation2 + $0x8] sm:$0xff] }
 0x3a5   : > { %1789 = vxpose.xlu1.b32.end [4/4] (short) (narrow) %v1671_v12, 8  ;;  %1819 = vxpose.xlu0.b32.cont [2/4] (short) (narrow) %v1679_v6, 8  ;;  %v3022_v8 = vpop.f32.mrb[8].mxu1 }
 0x3a6   : > { %v1691_v57 = vpop.f32.mrb[9].mxu1  ;;  %v1700_v21 = vadd.f32 %v3022_v8, %v3895_v3  ;;  %v3250_v8 = vld [vmem:[#allocation2 + $0x10] sm:$0xff] }
 0x3a7   : > { %v3023_v60 = vpop.f32.mrb[10].mxu1  ;;  %v1692_v29 = vadd.f32 %v3895_v3, %v1691_v57 }
 0x3a8   : > { %v1694_v44 = vpop.f32.mrb[11].mxu1  ;;  %v1703_v26 = vadd.f32 %v3023_v60, %v3895_v3  ;;  %v3251_v60 = vld [vmem:[#allocation2 + $0x18] sm:$0xff] }
 0x3a9   : > { %1820 = vxpose.xlu0.b32.cont [3/4] (short) (narrow) %v1684_v34, 8  ;;  %v1695_v7 = vadd.f32 %v3895_v3, %v1694_v44 }
 0x3ad   : > { %1821 = vxpose.xlu0.b32.end [4/4] (short) (narrow) %v1687_v51, 8  ;;  %v3026_v47 = vpop.f32.mrb[12].mxu1 }
 0x3ae   : > { %v1707_v48 = vpop.f32.mrb[13].mxu1  ;;  %v1716_v45 = vadd.f32 %v3026_v47, %v3895_v3 }
 0x3af   : > { %v1708_v43 = vadd.f32 %v3895_v3, %v1707_v48  ;;  %v3027_v13 = vpop.f32.mrb[14].mxu1 }
 0x3b0   : > { %v1710_v28 = vpop.f32.mrb[15].mxu1  ;;  %v1719_v22 = vadd.f32 %v3027_v13, %v3895_v3  ;;  %v3252_v13 = vld [vmem:[#allocation2 + $0x20] sm:$0xff] }
 0x3b1   : > { %1850 = vxpose.xlu0.b32.start [1/4] (short) (narrow) %v1692_v29, 8  ;;  %1882 = vxpose.xlu1.b32.start [1/4] (short) (narrow) %v1708_v43, 8  ;;  %v1711_v38 = vadd.f32 %v3895_v3, %v1710_v28 }
 0x3b5   : > { %1851 = vxpose.xlu0.b32.cont [2/4] (short) (narrow) %v1695_v7, 8  ;;  %1883 = vxpose.xlu1.b32.cont [2/4] (short) (narrow) %v1711_v38, 8  ;;  %v3030_v1 = vpop.f32.mrb[16].mxu1 }
 0x3b6   : > { %v1723_v19 = vpop.f32.mrb[17].mxu1  ;;  %v1732_v56 = vadd.f32 %v3030_v1, %v3895_v3 }
 0x3b7   : > { %v3031_v20 = vpop.f32.mrb[18].mxu1  ;;  %v1724_v46 = vadd.f32 %v3895_v3, %v1723_v19 }
 0x3b8   : > { %v1726_v5 = vpop.f32.mrb[19].mxu1  ;;  %v1735_v18 = vadd.f32 %v3031_v20, %v3895_v3 }
 0x3b9   : > { %1852 = vxpose.xlu0.b32.cont [3/4] (short) (narrow) %v1700_v21, 8  ;;  %1884 = vxpose.xlu1.b32.cont [3/4] (short) (narrow) %v1716_v45, 8  ;;  %v1727_v16 = vadd.f32 %v3895_v3, %v1726_v5  ;;  %v3253_v21 = vld [vmem:[#allocation2 + $0x28] sm:$0xff] }
 0x3bd   : > { %1853 = vxpose.xlu0.b32.end [4/4] (short) (narrow) %v1703_v26, 8  ;;  %1885 = vxpose.xlu1.b32.end [4/4] (short) (narrow) %v1719_v22, 8  ;;  %v3254_v26 = vld [vmem:[#allocation2 + $0x30] sm:$0xff] }
 0x3c1   : > { %1914 = vxpose.xlu0.b32.start [1/4] (short) (narrow) %v1724_v46, 8 }
 0x3c5   : > { %1915 = vxpose.xlu0.b32.cont [2/4] (short) (narrow) %v1727_v16, 8 }
 0x3c9   : > { %1916 = vxpose.xlu0.b32.cont [3/4] (short) (narrow) %v1732_v56, 8 }
 0x3ca   : > { %v3034_v39 = vpop.f32.mrb[20].mxu1 }
 0x3cb   : > { %v1739_v41 = vpop.f32.mrb[21].mxu1  ;;  %v1748_v10 = vadd.f32 %v3034_v39, %v3895_v3  ;;  %v3255_v39 = vld [vmem:[#allocation2 + $0x38] sm:$0xff] }
 0x3cc   : > { %v1740_v14 = vadd.f32 %v3895_v3, %v1739_v41  ;;  %v3035_v40 = vpop.f32.mrb[22].mxu1 }
 0x3cd   : > { %1917 = vxpose.xlu0.b32.end [4/4] (short) (narrow) %v1735_v18, 8  ;;  %v1742_v55 = vpop.f32.mrb[23].mxu1  ;;  %v1751_v53 = vadd.f32 %v3035_v40, %v3895_v3  ;;  %v4311_v40 = vld [vmem:[#allocation5_spill] sm:$0xff] }
 0x3ce   : > { %1946 = vxpose.xlu1.b32.start [1/4] (short) (narrow) %v1740_v14, 8  ;;  %v1743_v35 = vadd.f32 %v3895_v3, %v1742_v55  ;;  %v3300_v55 = vmov 3  }
 0x3d2   : > { %1947 = vxpose.xlu1.b32.cont [2/4] (short) (narrow) %v1743_v35, 8  ;;  %v4312_v35 = vld [vmem:[#allocation4_spill] sm:$0xff] }
 0x3d6   : > { %1948 = vxpose.xlu1.b32.cont [3/4] (short) (narrow) %v1748_v10, 8  ;;  %v4313_v10 = vld [vmem:[#allocation6_spill] sm:$0xff] }
 0x3da   : > { %1949 = vxpose.xlu1.b32.end [4/4] (short) (narrow) %v1751_v53, 8  ;;  %v4314_v53 = vld [vmem:[#allocation8_spill] sm:$0xff] }
 0x3e0   : > { %v3038_v24 = vpop.f32.mrb[24].mxu1 }
 0x3e1   : > { %v1755_v0 = vpop.f32.mrb[25].mxu1  ;;  %v1764_v42 = vadd.f32 %v3038_v24, %v3895_v3  ;;  %v4315_v24 = vld [vmem:[#allocation7_spill] sm:$0xff] }
 0x3e2   : > { %v1756_v30 = vadd.f32 %v3895_v3, %v1755_v0  ;;  %v3039_v50 = vpop.f32.mrb[26].mxu1  ;;  %v4316_v0 = vld [vmem:[#allocation9_spill] sm:$0xff] }
 0x3e3   : > { %v1758_v63 = vpop.f32.mrb[27].mxu1  ;;  %v1767_v52 = vadd.f32 %v3039_v50, %v3895_v3 }
 0x3e4   : > { %1978 = vxpose.xlu0.b32.start [1/4] (short) (narrow) %v1756_v30, 8  ;;  %v1759_v2 = vadd.f32 %v3895_v3, %v1758_v63 }
 0x3e8   : > { %1979 = vxpose.xlu0.b32.cont [2/4] (short) (narrow) %v1759_v2, 8 }
 0x3ec   : > { %1980 = vxpose.xlu0.b32.cont [3/4] (short) (narrow) %v1764_v42, 8 }
 0x3f0   : > { %1981 = vxpose.xlu0.b32.end [4/4] (short) (narrow) %v1767_v52, 8 }
 0x3f6   : > { %v3042_v11 = vpop.f32.mrb[28].mxu1 }
 0x3f7   : > { %v1771_v17 = vpop.f32.mrb[29].mxu1  ;;  %v1780_v58 = vadd.f32 %v3042_v11, %v3895_v3 }
 0x3f8   : > { %v1772_v33 = vadd.f32 %v3895_v3, %v1771_v17  ;;  %v3043_v31 = vpop.f32.mrb[30].mxu1 }
 0x3f9   : > { %v1774_v9 = vpop.f32.mrb[31].mxu1  ;;  %v1783_v36 = vadd.f32 %v3043_v31, %v3895_v3 }
 0x3fa   : > { %2010 = vxpose.xlu1.b32.start [1/4] (short) (narrow) %v1772_v33, 8  ;;  %v1775_v23 = vadd.f32 %v3895_v3, %v1774_v9 }
 0x3fe   : > { %2011 = vxpose.xlu1.b32.cont [2/4] (short) (narrow) %v1775_v23, 8 }
 0x402   : > { %2012 = vxpose.xlu1.b32.cont [3/4] (short) (narrow) %v1780_v58, 8 }
 0x406   : > { %2013 = vxpose.xlu1.b32.end [4/4] (short) (narrow) %v1783_v36, 8 }
 0x419   : > { %v1802_v25 = vpop.trf.xlu1  ;;  %3119 = vset.pattern.permute.xlu0 %v3299_v49 }
 0x41a   : > { %v2042_v62 = vadd.f32 %v3248_v61, %v1802_v25 }
 0x41c   : > { %2050 = vst.msk [vmem:[#allocation2] sm:$0xff] %vm523_vm1, %v2042_v62 }
 0x421   : > { %v1834_v37 = vpop.trf.xlu0 }
 0x422   : > { %v2043_v4 = vadd.f32 %v3249_v15, %v1834_v37 }
 0x423   : > { %v3931_v27 = vld [vmem:[#allocation2] sm:$0xff] }
 0x424   : > { %2051 = vst.msk [vmem:[#allocation2 + $0x8] sm:$0xff] %vm523_vm1, %v2043_v4  ;;  %v2066_v32 = vsel %vm523_vm1, %v3931_v27, 0.0  ;;  %3118 = vset.pattern.permute.xlu1 %v3299_v49 }
 0x425   : > { %2067 = vadd.xlane.f32.xlu0 %v2066_v32 }
 0x42b   : > { %v3937_v3 = vld [vmem:[#allocation2 + $0x8] sm:$0xff] }
 0x42c   : > { %v2069_v12 = vsel %vm523_vm1, %v3937_v3, 0.0 }
 0x42d   : > { %2070 = vadd.xlane.f32.xlu1 %v2069_v12 }
 0x431   : > { %v1866_v6 = vpop.trf.xlu0  ;;  %v1898_v57 = vpop.trf.xlu1 }
 0x432   : > { %v2044_v34 = vadd.f32 %v3250_v8, %v1866_v6  ;;  %v2045_v44 = vadd.f32 %v3251_v60, %v1898_v57 }
 0x434   : > { %2052 = vst.msk [vmem:[#allocation2 + $0x10] sm:$0xff] %vm523_vm1, %v2044_v34  ;;  %2053 = vst.msk [vmem:[#allocation2 + $0x18] sm:$0xff] %vm523_vm1, %v2045_v44 }
 0x43b   : > { %v3943_v51 = vld [vmem:[#allocation2 + $0x10] sm:$0xff]  ;;  %v3947_v29 = vld [vmem:[#allocation2 + $0x18] sm:$0xff] }
 0x43c   : > { %v2072_v47 = vsel %vm523_vm1, %v3943_v51, 0.0  ;;  %v2075_v48 = vsel %vm523_vm1, %v3947_v29, 0.0 }
 0x43d   : > { %2073 = vadd.xlane.f32.xlu0 %v2072_v47 }
 0x441   : > { %2076 = vadd.xlane.f32.xlu0 %v2075_v48  ;;  %v1930_v43 = vpop.trf.xlu0 }
 0x442   : > { %v2046_v28 = vadd.f32 %v3252_v13, %v1930_v43  ;;  %v3132_v13 = vld [vmem:[%s504_s22] sm:$0xff]  }
 0x443   : > { %3044 = vmatprep.subr.bf16.mxu0 %v3132_v13 }
 0x444   : > { %2054 = vst.msk [vmem:[#allocation2 + $0x20] sm:$0xff] %vm523_vm1, %v2046_v28  ;;  %3045 = vmatpush3.bf16.msra.mxu0 %v3132_v13 }
 0x44b   : > { %v3952_v7 = vld [vmem:[#allocation2 + $0x20] sm:$0xff] }
 0x44c   : > { %v2078_v38 = vsel %vm523_vm1, %v3952_v7, 0.0 }
 0x44d   : > { %2079 = vadd.xlane.f32.xlu1 %v2078_v38  ;;  %v3133_v38 = vld [vmem:[%s504_s22 + $0x8] sm:$0xff]  }
 0x44e   : > { %v1962_v1 = vpop.trf.xlu1  ;;  %3046 = vmatprep.subr.bf16.mxu0 %v3133_v38 }
 0x44f   : > { %v2047_v19 = vadd.f32 %v3253_v21, %v1962_v1  ;;  %3047 = vmatpush3.bf16.msra.mxu0 %v3133_v38 }
 0x451   : > { %2055 = vst.msk [vmem:[#allocation2 + $0x28] sm:$0xff] %vm523_vm1, %v2047_v19 }
 0x458   : > { %v3957_v45 = vld [vmem:[#allocation2 + $0x28] sm:$0xff] }
 0x459   : > { %v2081_v20 = vsel %vm523_vm1, %v3957_v45, 0.0 }
 0x45a   : > { %2082 = vadd.xlane.f32.xlu0 %v2081_v20 }
 0x464   : > { %v1994_v5 = vpop.trf.xlu0 }
 0x465   : > { %v2048_v22 = vadd.f32 %v3254_v26, %v1994_v5 }
 0x467   : > { %2056 = vst.msk [vmem:[#allocation2 + $0x30] sm:$0xff] %vm523_vm1, %v2048_v22  ;;  %v3301_v22 = vmov 4  }
 0x46e   : > { %v3962_v46 = vld [vmem:[#allocation2 + $0x30] sm:$0xff] }
 0x46f   : > { %v2084_v16 = vsel %vm523_vm1, %v3962_v46, 0.0 }
 0x470   : > { %2085 = vadd.xlane.f32.xlu1 %v2084_v16 }
 0x47a   : > { %v2026_v56 = vpop.trf.xlu1 }
 0x47b   : > { %v2049_v18 = vadd.f32 %v3255_v39, %v2026_v56 }
 0x47d   : > { %2057 = vst.msk [vmem:[#allocation2 + $0x38] sm:$0xff] %vm523_vm1, %v2049_v18  ;;  %v3302_v18 = vmov 5  }
 0x481   : > { %2195 = vperm.xlu1 %3118, %v3507_v54  }
 0x484   : > { %v3968_v41 = vld [vmem:[#allocation2 + $0x38] sm:$0xff] }
 0x485   : > { %2203 = vperm.xlu1 %3118, %v3515_v59   ;;  %v2087_v14 = vsel %vm523_vm1, %v3968_v41, 0.0 }
 0x486   : > { %2088 = vadd.xlane.f32.xlu0 %v2087_v14 }
 0x489   : > { %2207 = vperm.xlu1 %3118, %v4311_v40  }
 0x48d   : > { %3120 = vset.pattern.permute.xlu1 %v3300_v55 }
 0x48e   : > { %2235 = vperm.xlu1 %3120, %v3507_v54  }
 0x492   : > { %2239 = vperm.xlu1 %3120, %v4312_v35  }
 0x496   : > { %2243 = vperm.xlu1 %3120, %v3515_v59  }
 0x49a   : > { %2247 = vperm.xlu1 %3120, %v4311_v40  }
 0x49c   : > { %2199 = vperm.xlu0 %3119, %v4312_v35  }
 0x49e   : > { %3121 = vset.pattern.permute.xlu1 %v3299_v49 }
 0x49f   : > { %2211 = vperm.xlu1 %3121, %v4313_v10  }
 0x4a0   : > { %2219 = vperm.xlu0 %3119, %v4314_v53  }
 0x4a3   : > { %2215 = vperm.xlu1 %3121, %v4315_v24  }
 0x4a4   : > { %3122 = vset.pattern.permute.xlu0 %v3300_v55 }
 0x4a5   : > { %2251 = vperm.xlu0 %3122, %v4313_v10  }
 0x4a7   : > { %2223 = vperm.xlu1 %3121, %v4316_v0  }
 0x4ab   : > { %3123 = vset.pattern.permute.xlu1 %v3300_v55 }
 0x4ac   : > { %2255 = vperm.xlu1 %3123, %v4315_v24  }
 0x4b2   : > { %v2068_v42 = vpop.xlane.xlu0 %2067 }
 0x4b3   : > { %v2090_v52 = vmul.f32 0.03125, %v2068_v42 }
 0x4b5   : > { %v3993_v17 = vsub.f32 %v3931_v27, %v2090_v52 }
 0x4b7   : > { %v2106_v9 = vmul.f32 %v3993_v17, %v3993_v17 }
 0x4b9   : > { %v2114_v25 = vsel %vm523_vm1, %v2106_v9, 0.0 }
 0x4ba   : > { %v2071_v30 = vpop.xlane.xlu1 %2070 }
 0x4bb   : > { %v2091_v50 = vmul.f32 0.03125, %v2071_v30 }
 0x4bd   : > { %v3987_v63 = vsub.f32 %v3937_v3, %v2091_v50 }
 0x4bf   : > { %v2107_v2 = vmul.f32 %v3987_v63, %v3987_v63 }
 0x4c1   : > { %v2117_v11 = vsel %vm523_vm1, %v2107_v2, 0.0 }
 0x4c4   : > { %2118 = vadd.xlane.f32.xlu0 %v2117_v11 }
 0x4ca   : > { %v2074_v33 = vpop.xlane.xlu0 %2073 }
 0x4cb   : > { %v2092_v31 = vmul.f32 0.03125, %v2074_v33 }
 0x4cd   : > { %v3998_v23 = vsub.f32 %v3943_v51, %v2092_v31 }
 0x4ce   : > { %v2077_v58 = vpop.xlane.xlu0 %2076 }
 0x4cf   : > { %v2093_v36 = vmul.f32 0.03125, %v2077_v58  ;;  %v2108_v49 = vmul.f32 %v3998_v23, %v3998_v23 }
 0x4d0   : > { %2115 = vadd.xlane.f32.xlu1 %v2114_v25 }
 0x4d1   : > { %v4004_v61 = vsub.f32 %v3947_v29, %v2093_v36  ;;  %v2120_v62 = vsel %vm523_vm1, %v2108_v49, 0.0  ;;  %v4317_v36 = vld [vmem:[#allocation3_spill] sm:$0xff] }
 0x4d3   : > { %v2109_v37 = vmul.f32 %v4004_v61, %v4004_v61 }
 0x4d4   : > { %2121 = vadd.xlane.f32.xlu1 %v2120_v62 }
 0x4d5   : > { %v2123_v15 = vsel %vm523_vm1, %v2109_v37, 0.0 }
 0x4d6   : > { %2124 = vadd.xlane.f32.xlu0 %v2123_v15 }
 0x4da   : > { %v2080_v4 = vpop.xlane.xlu1 %2079 }
 0x4db   : > { %v2094_v32 = vmul.f32 0.03125, %v2080_v4  ;;  %v4082_v4 = vld [vmem:[%s3385_s20] sm:$0xff] }
 0x4dd   : > { %v4011_v12 = vsub.f32 %v3952_v7, %v2094_v32 }
 0x4df   : > { %v2110_v6 = vmul.f32 %v4011_v12, %v4011_v12 }
 0x4e1   : > { %v2126_v8 = vsel %vm523_vm1, %v2110_v6, 0.0 }
 0x4e2   : > { %2127 = vadd.xlane.f32.xlu1 %v2126_v8  ;;  %v2184_v8 = vsub.s32 6, %v4317_v36 }
 0x4e7   : > { %v2083_v34 = vpop.xlane.xlu0 %2082 }
 0x4e8   : > { %v2095_v57 = vmul.f32 0.03125, %v2083_v34 }
 0x4ea   : > { %v4017_v60 = vsub.f32 %v3957_v45, %v2095_v57 }
 0x4ec   : > { %v2111_v44 = vmul.f32 %v4017_v60, %v4017_v60 }
 0x4ee   : > { %v2129_v47 = vsel %vm523_vm1, %v2111_v44, 0.0  ;;  %v4091_v44 = vrot.slane %v4082_v4, %v2184_v8 }
 0x4ef   : > { %2130 = vadd.xlane.f32.xlu0 %v2129_v47 }
 0x4fd   : > { %v2086_v48 = vpop.xlane.xlu1 %2085 }
 0x4fe   : > { %v2096_v43 = vmul.f32 0.03125, %v2086_v48 }
 0x500   : > { %v4027_v28 = vsub.f32 %v3962_v46, %v2096_v43 }
 0x501   : > { %v4040_v56 = vpop.permute.xlu1 %2195 }
 0x502   : > { %v2112_v1 = vmul.f32 %v4027_v28, %v4027_v28 }
 0x504   : > { %v2132_v21 = vsel %vm523_vm1, %v2112_v1, 0.0 }
 0x505   : > { %2133 = vadd.xlane.f32.xlu1 %v2132_v21  ;;  %v4043_v39 = vpop.permute.xlu1 %2203 }
 0x509   : > { %v4047_v14 = vpop.permute.xlu1 %2207 }
 0x50d   : > { %v4050_v55 = vpop.permute.xlu1 %2235 }
 0x511   : > { %v4054_v30 = vpop.permute.xlu1 %2239 }
 0x513   : > { %v2089_v19 = vpop.xlane.xlu0 %2088 }
 0x514   : > { %v2097_v20 = vmul.f32 0.03125, %v2089_v19 }
 0x515   : > { %v4060_v50 = vpop.permute.xlu1 %2243 }
 0x516   : > { %v4033_v5 = vsub.f32 %v3968_v41, %v2097_v20  ;;  %2259 = vperm.xlu1 %3123, %v4314_v53  }
 0x518   : > { %v2113_v26 = vmul.f32 %v4033_v5, %v4033_v5 }
 0x51a   : > { %3124 = vset.pattern.permute.xlu1 %v3301_v22  ;;  %v2135_v16 = vsel %vm523_vm1, %v2113_v26, 0.0 }
 0x51b   : > { %2412 = vperm.xlu1 %3124, %v3507_v54   ;;  %2136 = vadd.xlane.f32.xlu0 %v2135_v16  ;;  %v2200_v2 = vpop.permute.xlu0 %2199 }
 0x51f   : > { %2420 = vperm.xlu1 %3124, %v3515_v59  }
 0x523   : > { %2424 = vperm.xlu1 %3124, %v4311_v40  }
 0x527   : > { %3126 = vset.pattern.permute.xlu1 %v3302_v18 }
 0x528   : > { %2456 = vperm.xlu1 %3126, %v4312_v35  }
 0x52c   : > { %2460 = vperm.xlu1 %3126, %v3515_v59   ;;  %v2248_v59 = vpop.permute.xlu1 %2247 }
 0x530   : > { %3127 = vset.pattern.permute.xlu1 %v3301_v22  ;;  %v4066_v42 = vpop.permute.xlu1 %2211 }
 0x531   : > { %2428 = vperm.xlu1 %3127, %v4313_v10   ;;  %2263 = vperm.xlu0 %3122, %v4316_v0  }
 0x534   : > { %v4072_v52 = vpop.permute.xlu1 %2215 }
 0x535   : > { %2436 = vperm.xlu1 %3127, %v4314_v53   ;;  %3125 = vset.pattern.permute.xlu0 %v3301_v22 }
 0x536   : > { %2416 = vperm.xlu0 %3125, %v4312_v35   ;;  %v4068_v35 = vpop.permute.xlu0 %2219 }
 0x538   : > { %v4076_v33 = vpop.permute.xlu1 %2223 }
 0x539   : > { %2440 = vperm.xlu1 %3127, %v4316_v0  }
 0x53a   : > { %2432 = vperm.xlu0 %3125, %v4315_v24  }
 0x53d   : > { %3129 = vset.pattern.permute.xlu1 %v3302_v18 }
 0x53e   : > { %2472 = vperm.xlu1 %3129, %v4315_v24   ;;  %3128 = vset.pattern.permute.xlu0 %v3302_v18  ;;  %v4074_v24 = vpop.permute.xlu0 %2251 }
 0x53f   : > { %2452 = vperm.xlu0 %3128, %v3507_v54  }
 0x542   : > { %2476 = vperm.xlu1 %3129, %v4314_v53  }
 0x543   : > { %2464 = vperm.xlu0 %3128, %v4311_v40   ;;  %v4078_v40 = vpop.permute.xlu1 %2255 }
 0x547   : > { %2468 = vperm.xlu0 %3128, %v4313_v10   ;;  %v2172_v10 = vsub.s32 5, %v4317_v36 }
 0x549   : > { %v4085_v32 = vrot.slane %v4082_v4, %v2172_v10 }
 0x54b   : > { %2480 = vperm.xlu0 %3128, %v4316_v0  }
 0x551   : > { %v2119_v11 = vpop.xlane.xlu0 %2118 }
 0x552   : > { %v2139_v54 = vmul.f32 0.03125, %v2119_v11 }
 0x554   : > { %v2147_v53 = vadd.f32 1e-05, %v2139_v54 }
 0x556   : > { %3216 = vrsqrt.f32 %v2147_v53 }
 0x55d   : > { %v2116_v31 = vpop.xlane.xlu1 %2115 }
 0x55e   : > { %v2138_v9 = vmul.f32 0.03125, %v2116_v31 }
 0x560   : > { %v2146_v58 = vadd.f32 1e-05, %v2138_v9  ;;  %v3217_v0 = vpop.eup %3216 }
 0x561   : > { %v2122_v25 = vpop.xlane.xlu1 %2121  ;;  %v2163_v6 = vmul.f32 %v3217_v0, %v3987_v63 }
 0x562   : > { %3218 = vrsqrt.f32 %v2146_v58  ;;  %v2140_v49 = vmul.f32 0.03125, %v2122_v25 }
 0x563   : > { %v2125_v62 = vpop.xlane.xlu0 %2124  ;;  %v2175_v57 = vmul.f32 %v4085_v32, %v2163_v6 }
 0x564   : > { %v2148_v37 = vadd.f32 1e-05, %v2140_v49  ;;  %v2141_v15 = vmul.f32 0.03125, %v2125_v62 }
 0x565   : > { %v2187_v43 = vadd.f32 %v4091_v44, %v2175_v57 }
 0x566   : > { %3220 = vrsqrt.f32 %v2148_v37  ;;  %v2149_v34 = vadd.f32 1e-05, %v2141_v15 }
 0x567   : > { %v2227_v20 = vmul.f32 %v2200_v2, %v2187_v43 }
 0x568   : > { %3222 = vrsqrt.f32 %v2149_v34 }
 0x569   : > { %v2267_v31 = vadd.f32 %v4054_v30, %v2227_v20 }
 0x56c   : > { %v3219_v47 = vpop.eup %3218 }
 0x56d   : > { %v2162_v48 = vmul.f32 %v3219_v47, %v3993_v17 }
 0x56f   : > { %v2174_v13 = vmul.f32 %v4085_v32, %v2162_v48  ;;  %v2128_v38 = vpop.xlane.xlu1 %2127 }
 0x570   : > { %v3221_v1 = vpop.eup %3220  ;;  %v2142_v63 = vmul.f32 0.03125, %v2128_v38 }
 0x571   : > { %v2164_v21 = vmul.f32 %v3221_v1, %v3998_v23  ;;  %v2186_v19 = vadd.f32 %v4091_v44, %v2174_v13 }
 0x572   : > { %v3223_v26 = vpop.eup %3222  ;;  %v2150_v18 = vadd.f32 1e-05, %v2142_v63 }
 0x573   : > { %v2176_v22 = vmul.f32 %v4085_v32, %v2164_v21  ;;  %v2165_v16 = vmul.f32 %v3223_v26, %v4004_v61  ;;  %v2226_v17 = vmul.f32 %v4040_v56, %v2186_v19 }
 0x574   : > { %3224 = vrsqrt.f32 %v2150_v18 }
 0x575   : > { %v2188_v11 = vadd.f32 %v4091_v44, %v2176_v22  ;;  %v2177_v54 = vmul.f32 %v4085_v32, %v2165_v16  ;;  %v2266_v53 = vadd.f32 %v4050_v55, %v2226_v17  ;;  %v3135_v17 = vld [vmem:[%s510_s26 + $0x8] sm:$0xff]  }
 0x577   : > { %v2228_v23 = vmul.f32 %v4043_v39, %v2188_v11  ;;  %v2189_v2 = vadd.f32 %v4091_v44, %v2177_v54  ;;  %v2274_v9 = vpack.c.bf16 %v2267_v31, %v2266_v53 }
 0x579   : > { %v2229_v58 = vmul.f32 %v4047_v14, %v2189_v2  ;;  %3048 = vmatprep.mubr.msk.bf16.mxu0 %vm523_vm1, %v2274_v9  ;;  %v2268_v61 = vadd.f32 %v4060_v50, %v2228_v23 }
 0x57b   : > { %v2269_v56 = vadd.f32 %v2248_v59, %v2229_v58 }
 0x57c   : > { %v2131_v10 = vpop.xlane.xlu0 %2130 }
 0x57d   : > { %v2143_v25 = vmul.f32 0.03125, %v2131_v10  ;;  %v2275_v0 = vpack.c.bf16 %v2269_v56, %v2268_v61 }
 0x57e   : > { %v3225_v55 = vpop.eup %3224 }
 0x57f   : > { %v2151_v49 = vadd.f32 1e-05, %v2143_v25  ;;  %3049 = vmatmul.mubr.msk.bf16.vlgmr.msra.gmra.mrb[32].mxu0 %vm523_vm1, %v2275_v0  ;;  %v2166_v39 = vmul.f32 %v3225_v55, %v4011_v12 }
 0x581   : > { %3226 = vrsqrt.f32 %v2151_v49  ;;  %v2178_v30 = vmul.f32 %v4085_v32, %v2166_v39 }
 0x583   : > { %v2190_v37 = vadd.f32 %v4091_v44, %v2178_v30 }
 0x585   : > { %v2230_v15 = vmul.f32 %v4066_v42, %v2190_v37 }
 0x587   : > { %v2270_v8 = vadd.f32 %v4074_v24, %v2230_v15 }
 0x58b   : > { %v3227_v62 = vpop.eup %3226 }
 0x58c   : > { %v2167_v14 = vmul.f32 %v3227_v62, %v4017_v60 }
 0x58e   : > { %v2179_v50 = vmul.f32 %v4085_v32, %v2167_v14 }
 0x590   : > { %v2191_v59 = vadd.f32 %v4091_v44, %v2179_v50 }
 0x592   : > { %v2231_v6 = vmul.f32 %v4072_v52, %v2191_v59  ;;  %v2134_v57 = vpop.xlane.xlu1 %2133 }
 0x593   : > { %v2144_v47 = vmul.f32 0.03125, %v2134_v57 }
 0x594   : > { %v2271_v34 = vadd.f32 %v4078_v40, %v2231_v6 }
 0x595   : > { %v2152_v60 = vadd.f32 1e-05, %v2144_v47 }
 0x596   : > { %v2276_v12 = vpack.c.bf16 %v2271_v34, %v2270_v8  ;;  %v2260_v26 = vpop.permute.xlu1 %2259 }
 0x597   : > { %3228 = vrsqrt.f32 %v2152_v60 }
 0x598   : > { %3052 = vmatprep.mubr.msk.bf16.mxu0 %vm523_vm1, %v2276_v12 }
 0x5a1   : > { %v3229_v38 = vpop.eup %3228 }
 0x5a2   : > { %v2168_v42 = vmul.f32 %v3229_v38, %v4027_v28 }
 0x5a4   : > { %v2180_v52 = vmul.f32 %v4085_v32, %v2168_v42 }
 0x5a6   : > { %v2192_v40 = vadd.f32 %v4091_v44, %v2180_v52 }
 0x5a8   : > { %v2137_v48 = vpop.xlane.xlu0 %2136  ;;  %v2232_v21 = vmul.f32 %v4068_v35, %v2192_v40  ;;  %v2280_v35 = vsub.s32 7, %v4317_v36 }
 0x5a9   : > { %v2145_v43 = vmul.f32 0.03125, %v2137_v48 }
 0x5aa   : > { %v2272_v16 = vadd.f32 %v2260_v26, %v2232_v21 }
 0x5ab   : > { %v2153_v13 = vadd.f32 1e-05, %v2145_v43 }
 0x5ad   : > { %3230 = vrsqrt.f32 %v2153_v13 }
 0x5b0   : > { %v2264_v22 = vpop.permute.xlu0 %2263 }
 0x5b5   : > { %v2417_v36 = vpop.permute.xlu0 %2416 }
 0x5b7   : > { %v3231_v24 = vpop.eup %3230 }
 0x5b8   : > { %v2169_v1 = vmul.f32 %v3231_v24, %v4033_v5  ;;  %v3134_v5 = vld [vmem:[%s510_s26] sm:$0xff]  }
 0x5b9   : > { %3056 = vmatprep.subr.bf16.mxu1 %v3134_v5  ;;  %v4143_v0 = vpop.permute.xlu0 %2432 }
 0x5ba   : > { %v2181_v63 = vmul.f32 %v4085_v32, %v2169_v1  ;;  %3057 = vmatpush3.bf16.msra.mxu1 %v3134_v5  ;;  %v2413_v32 = vpop.permute.xlu1 %2412 }
 0x5bb   : > { %3058 = vmatprep.subr.bf16.mxu1 %v3135_v17 }
 0x5bc   : > { %v2193_v19 = vadd.f32 %v4091_v44, %v2181_v63 }
 0x5be   : > { %v2233_v20 = vmul.f32 %v4076_v33, %v2193_v19  ;;  %3059 = vmatpush3.bf16.msra.mxu1 %v3135_v17  ;;  %v4137_v33 = vrot.slane %v4082_v4, %v2280_v35  ;;  %v2421_v56 = vpop.permute.xlu1 %2420  ;;  %v2453_v37 = vpop.permute.xlu0 %2452 }
 0x5c0   : > { %v2273_v18 = vadd.f32 %v2264_v22, %v2233_v20 }
 0x5c2   : > { %v2277_v28 = vpack.c.bf16 %v2273_v18, %v2272_v16  ;;  %v2425_v25 = vpop.permute.xlu1 %2424  ;;  %v2465_v52 = vpop.permute.xlu0 %2464 }
 0x5c4   : > { %3053 = vmatmul.mubr.msk.bf16.gmra.mrb[36].mxu0 %vm523_vm1, %v2277_v28 }
 0x5c6   : > { %v2457_v14 = vpop.permute.xlu1 %2456 }
 0x5ca   : > { %v2461_v42 = vpop.permute.xlu1 %2460 }
 0x5ce   : > { %v2429_v26 = vpop.permute.xlu1 %2428 }
 0x652   : > { %v3050_v44 = vpop.f32.mrb[32].mxu0 }
 0x653   : > { %v2349_v11 = vadd.f32 %v3050_v44, %v4137_v33  ;;  %v2340_v54 = vpop.f32.mrb[33].mxu0 }
 0x654   : > { %v2341_v53 = vadd.f32 %v2340_v54, %v4137_v33  ;;  %v3051_v31 = vpop.f32.mrb[34].mxu0  ;;  %v2437_v54 = vpop.permute.xlu1 %2436 }
 0x655   : > { %v2381_v23 = vmul.f32 0.70710677, %v2349_v11  ;;  %v2352_v2 = vadd.f32 %v3051_v31, %v4137_v33  ;;  %v2343_v9 = vpop.f32.mrb[35].mxu0  ;;  %v2373_v39 = vmul.f32 0.5, %v2349_v11 }
 0x656   : > { %v2379_v58 = vmul.f32 0.70710677, %v2341_v53  ;;  %v2344_v61 = vadd.f32 %v2343_v9, %v4137_v33  ;;  %v2371_v50 = vmul.f32 0.5, %v2341_v53 }
 0x657   : > { %3232 = verf.f32 %v2381_v23  ;;  %v2382_v4 = vmul.f32 0.70710677, %v2352_v2  ;;  %v2374_v8 = vmul.f32 0.5, %v2352_v2 }
 0x658   : > { %3234 = verf.f32 %v2379_v58  ;;  %v2380_v10 = vmul.f32 0.70710677, %v2344_v61  ;;  %v2372_v57 = vmul.f32 0.5, %v2344_v61  ;;  %v2441_v23 = vpop.permute.xlu1 %2440 }
 0x659   : > { %3236 = verf.f32 %v2382_v4  ;;  %v2469_v4 = vpop.permute.xlu0 %2468 }
 0x65a   : > { %3238 = verf.f32 %v2380_v10 }
 0x661   : > { %v3233_v49 = vpop.eup %3232 }
 0x662   : > { %v3235_v55 = vpop.eup %3234  ;;  %v2397_v30 = vadd.f32 1.0, %v3233_v49 }
 0x663   : > { %v3237_v62 = vpop.eup %3236  ;;  %v2395_v59 = vadd.f32 1.0, %v3235_v55 }
 0x664   : > { %v3239_v15 = vpop.eup %3238  ;;  %v2405_v6 = vmul.f32 %v2397_v30, %v2373_v39  ;;  %v2398_v34 = vadd.f32 1.0, %v3237_v62 }
 0x665   : > { %v2403_v12 = vmul.f32 %v2395_v59, %v2371_v50  ;;  %v2396_v47 = vadd.f32 1.0, %v3239_v15 }
 0x666   : > { %v2445_v60 = vmul.f32 %v2421_v56, %v2405_v6  ;;  %v2406_v48 = vmul.f32 %v2398_v34, %v2374_v8  ;;  %v2481_v34 = vpop.permute.xlu0 %2480 }
 0x667   : > { %v2443_v43 = vmul.f32 %v2413_v32, %v2403_v12  ;;  %v2404_v13 = vmul.f32 %v2396_v47, %v2372_v57 }
 0x668   : > { %v2446_v38 = vmul.f32 %v2425_v25, %v2406_v48  ;;  %v2485_v40 = vadd.f32 %v2461_v42, %v2445_v60 }
 0x669   : > { %v2444_v24 = vmul.f32 %v2417_v36, %v2404_v13  ;;  %v2483_v63 = vadd.f32 %v2453_v37, %v2443_v43  ;;  %v2473_v36 = vpop.permute.xlu1 %2472 }
 0x66a   : > { %v2486_v1 = vadd.f32 %v2465_v52, %v2446_v38  ;;  %v2908_v38 = vld [vmem:[%s3385_s20 + $0x8] ss:$0 sm:$0xff] }
 0x66b   : > { %v2484_v21 = vadd.f32 %v2457_v14, %v2444_v24 }
 0x66c   : > { %v2492_v19 = vpack.c.bf16 %v2486_v1, %v2485_v40 }
 0x66d   : > { %v2491_v20 = vpack.c.bf16 %v2484_v21, %v2483_v63  ;;  %v2477_v8 = vpop.permute.xlu1 %2476 }
 0x66f   : > { %3060 = vmatprep.mubr.msk.bf16.mxu1 %vm523_vm1, %v2491_v20 }
 0x670   : > { %3061 = vmatmul.mubr.msk.bf16.vlgmr.msra.gmra.mrb[32].mxu1 %vm523_vm1, %v2492_v19 }
 0x697   : > { %v3054_v22 = vpop.f32.mrb[36].mxu0 }
 0x698   : > { %v2365_v16 = vadd.f32 %v3054_v22, %v4137_v33  ;;  %v2356_v18 = vpop.f32.mrb[37].mxu0 }
 0x699   : > { %v2357_v28 = vadd.f32 %v2356_v18, %v4137_v33  ;;  %v3055_v5 = vpop.f32.mrb[38].mxu0 }
 0x69a   : > { %v2385_v17 = vmul.f32 0.70710677, %v2365_v16  ;;  %v2368_v35 = vadd.f32 %v3055_v5, %v4137_v33  ;;  %v2359_v32 = vpop.f32.mrb[39].mxu0  ;;  %v2377_v58 = vmul.f32 0.5, %v2365_v16 }
 0x69b   : > { %v2383_v44 = vmul.f32 0.70710677, %v2357_v28  ;;  %v2360_v11 = vadd.f32 %v2359_v32, %v4137_v33  ;;  %v2375_v10 = vmul.f32 0.5, %v2357_v28 }
 0x69c   : > { %3240 = verf.f32 %v2385_v17  ;;  %v2386_v53 = vmul.f32 0.70710677, %v2368_v35  ;;  %v2378_v33 = vmul.f32 0.5, %v2368_v35 }
 0x69d   : > { %3242 = verf.f32 %v2383_v44  ;;  %v2384_v31 = vmul.f32 0.70710677, %v2360_v11  ;;  %v2376_v62 = vmul.f32 0.5, %v2360_v11 }
 0x69e   : > { %3244 = verf.f32 %v2386_v53 }
 0x69f   : > { %3246 = verf.f32 %v2384_v31 }
 0x6a6   : > { %v3241_v2 = vpop.eup %3240 }
 0x6a7   : > { %v3243_v9 = vpop.eup %3242  ;;  %v2401_v61 = vadd.f32 1.0, %v3241_v2 }
 0x6a8   : > { %v3245_v56 = vpop.eup %3244  ;;  %v2399_v25 = vadd.f32 1.0, %v3243_v9 }
 0x6a9   : > { %v3247_v49 = vpop.eup %3246  ;;  %v2409_v55 = vmul.f32 %v2401_v61, %v2377_v58  ;;  %v2402_v39 = vadd.f32 1.0, %v3245_v56 }
 0x6aa   : > { %v2407_v30 = vmul.f32 %v2399_v25, %v2375_v10  ;;  %v2400_v14 = vadd.f32 1.0, %v3247_v49 }
 0x6ab   : > { %v2449_v37 = vmul.f32 %v2437_v54, %v2409_v55  ;;  %v2410_v50 = vmul.f32 %v2402_v39, %v2378_v33 }
 0x6ac   : > { %v2447_v59 = vmul.f32 %v2429_v26, %v2407_v30  ;;  %v2408_v15 = vmul.f32 %v2400_v14, %v2376_v62 }
 0x6ad   : > { %v2450_v6 = vmul.f32 %v2441_v23, %v2410_v50  ;;  %v2489_v57 = vadd.f32 %v2477_v8, %v2449_v37 }
 0x6ae   : > { %v2448_v12 = vmul.f32 %v4143_v0, %v2408_v15  ;;  %v2487_v60 = vadd.f32 %v2469_v4, %v2447_v59 }
 0x6af   : > { %v2490_v47 = vadd.f32 %v2481_v34, %v2450_v6 }
 0x6b0   : > { %v2488_v48 = vadd.f32 %v2473_v36, %v2448_v12 }
 0x6b1   : > { %v2494_v43 = vpack.c.bf16 %v2490_v47, %v2489_v57 }
 0x6b2   : > { %v2493_v13 = vpack.c.bf16 %v2488_v48, %v2487_v60 }
 0x6b4   : > { %3064 = vmatprep.mubr.msk.bf16.mxu1 %vm523_vm1, %v2493_v13 }
 0x6b5   : > { %3065 = vmatmul.mubr.msk.bf16.gmra.mrb[36].mxu1 %vm523_vm1, %v2494_v43 }
 0x743   : > { %v3062_v42 = vpop.f32.mrb[32].mxu1 }
 0x744   : > { %v2566_v52 = vadd.f32 %v3062_v42, %v2908_v38  ;;  %v2557_v24 = vpop.f32.mrb[33].mxu1 }
 0x745   : > { %v2558_v40 = vadd.f32 %v2908_v38, %v2557_v24  ;;  %v3063_v1 = vpop.f32.mrb[34].mxu1 }
 0x746   : > { %v2590_v63 = vadd.f32 %v2566_v52, %v3943_v51  ;;  %v2569_v21 = vadd.f32 %v3063_v1, %v2908_v38  ;;  %v2560_v0 = vpop.f32.mrb[35].mxu1 }
 0x747   : > { %v2588_v19 = vadd.f32 %v2558_v40, %v3931_v27  ;;  %v2561_v20 = vadd.f32 %v2908_v38, %v2560_v0 }
 0x748   : > { %2598 = vst.msk [vmem:[#allocation2 + $0x10] sm:$0xff] %vm523_vm1, %v2590_v63  ;;  %v2591_v26 = vadd.f32 %v2569_v21, %v3947_v29 }
 0x749   : > { %2596 = vst.msk [vmem:[#allocation2] sm:$0xff] %vm523_vm1, %v2588_v19  ;;  %v2589_v22 = vadd.f32 %v2561_v20, %v3937_v3 }
 0x74a   : > { %2599 = vst.msk [vmem:[#allocation2 + $0x18] sm:$0xff] %vm523_vm1, %v2591_v26 }
 0x74b   : > { %2597 = vst.msk [vmem:[#allocation2 + $0x8] sm:$0xff] %vm523_vm1, %v2589_v22  ;;  %v2613_v11 = vsel (!%p2915_p6), %vm523_vm1, %v2589_v22, 0.0 }
 0x788   : > { %v3066_v16 = vpop.f32.mrb[36].mxu1 }
 0x789   : > { %v2582_v18 = vadd.f32 %v3066_v16, %v2908_v38  ;;  %v2573_v51 = vpop.f32.mrb[37].mxu1 }
 0x78a   : > { %v2574_v28 = vadd.f32 %v2908_v38, %v2573_v51  ;;  %v3067_v5 = vpop.f32.mrb[38].mxu1  ;;  %2607 = sbr.rel (%p2915_p6) target bundleno = 2261 (0x8d5), region = 64 }
 0x78b   : > { %v4164_v27 = vadd.f32 %v2582_v18, %v3962_v46  ;;  %v2585_v17 = vadd.f32 %v3067_v5, %v2908_v38  ;;  %v2576_v35 = vpop.f32.mrb[39].mxu1  ;;  %v2610_v46 = vsel (!%p2915_p6), %vm523_vm1, %v2588_v19, 0.0 }
 0x78c   : > { %v2592_v29 = vadd.f32 %v2574_v28, %v3952_v7  ;;  %v2577_v32 = vadd.f32 %v2908_v38, %v2576_v35  ;;  %v2616_v7 = vsel (!%p2915_p6), %vm523_vm1, %v2590_v63, 0.0  ;;  %2611 = vadd.xlane.f32.xlu0 (!%p2915_p6), %v2610_v46 }
 0x78d   : > { %2602 = vst.msk [vmem:[#allocation2 + $0x30] sm:$0xff] %vm523_vm1, %v4164_v27  ;;  %v2595_v3 = vadd.f32 %v2585_v17, %v3968_v41  ;;  %2617 = vadd.xlane.f32.xlu1 (!%p2915_p6), %v2616_v7  ;;  %v2619_v41 = vsel (!%p2915_p6), %vm523_vm1, %v2591_v26, 0.0  ;;  %v2628_v53 = vsel (!%p2915_p6), %vm523_vm1, %v4164_v27, 0.0 }
 0x78e   : > { %2600 = vst.msk [vmem:[#allocation2 + $0x20] sm:$0xff] %vm523_vm1, %v2592_v29  ;;  %v2593_v44 = vadd.f32 %v2577_v32, %v3957_v45  ;;  %v2622_v45 = vsel (!%p2915_p6), %vm523_vm1, %v2592_v29, 0.0 }
 0x78f   : > { %2603 = vst.msk [vmem:[#allocation2 + $0x38] sm:$0xff] %vm523_vm1, %v2595_v3  ;;  %v2631_v31 = vsel (!%p2915_p6), %vm523_vm1, %v2595_v3, 0.0 }
 0x790   : > { %2601 = vst.msk [vmem:[#allocation2 + $0x28] sm:$0xff] %vm523_vm1, %v2593_v44  ;;  %2614 = vadd.xlane.f32.xlu0 (!%p2915_p6), %v2613_v11  ;;  %v2625_v54 = vsel (!%p2915_p6), %vm523_vm1, %v2593_v44, 0.0 }
 0x791   : > { %2620 = vadd.xlane.f32.xlu1 %v2619_v41 }
 0x794   : > { %2623 = vadd.xlane.f32.xlu0 %v2622_v45  ;;  %v2916_v45 = vld [vmem:[%s4288_s8] ss:$0 sm:$0xff] }
 0x795   : > { %2626 = vadd.xlane.f32.xlu1 %v2625_v54 }
 0x798   : > { %2629 = vadd.xlane.f32.xlu0 %v2628_v53 }
 0x799   : > { %2632 = vadd.xlane.f32.xlu1 %v2631_v31 }
 0x819   : > { %v2612_v23 = vpop.xlane.xlu0 %2611 }
 0x81a   : > { %v2618_v2 = vpop.xlane.xlu1 %2617  ;;  %v2634_v9 = vmul.f32 0.03125, %v2612_v23 }
 0x81b   : > { %v2636_v58 = vmul.f32 0.03125, %v2618_v2  ;;  %v2917_v2 = vld [vmem:[%s4288_s8 + $0x1] ss:$0 sm:$0xff] }
 0x81c   : > { %v4184_v61 = vsub.f32 %v2588_v19, %v2634_v9 }
 0x81d   : > { %v4186_v56 = vsub.f32 %v2590_v63, %v2636_v58  ;;  %v2615_v36 = vpop.xlane.xlu0 %2614 }
 0x81e   : > { %v2621_v4 = vpop.xlane.xlu1 %2620  ;;  %v2635_v10 = vmul.f32 0.03125, %v2615_v36  ;;  %v2650_v49 = vmul.f32 %v4184_v61, %v4184_v61 }
 0x81f   : > { %v2637_v25 = vmul.f32 0.03125, %v2621_v4  ;;  %v2652_v55 = vmul.f32 %v4186_v56, %v4186_v56 }
 0x820   : > { %v4192_v33 = vsub.f32 %v2589_v22, %v2635_v10  ;;  %v2658_v30 = vsel %vm523_vm1, %v2650_v49, 0.0 }
 0x821   : > { %v4194_v39 = vsub.f32 %v2591_v26, %v2637_v25  ;;  %2659 = vadd.xlane.f32.xlu0 %v2658_v30  ;;  %v2624_v62 = vpop.xlane.xlu0 %2623  ;;  %v2664_v37 = vsel %vm523_vm1, %v2652_v55, 0.0 }
 0x822   : > { %v2627_v14 = vpop.xlane.xlu1 %2626  ;;  %v2638_v50 = vmul.f32 0.03125, %v2624_v62  ;;  %v2651_v15 = vmul.f32 %v4192_v33, %v4192_v33 }
 0x823   : > { %v2639_v59 = vmul.f32 0.03125, %v2627_v14  ;;  %v2653_v6 = vmul.f32 %v4194_v39, %v4194_v39 }
 0x824   : > { %v4202_v8 = vsub.f32 %v2592_v29, %v2638_v50  ;;  %v2661_v12 = vsel %vm523_vm1, %v2651_v15, 0.0 }
 0x825   : > { %v4204_v34 = vsub.f32 %v2593_v44, %v2639_v59  ;;  %2665 = vadd.xlane.f32.xlu0 %v2664_v37  ;;  %2662 = vadd.xlane.f32.xlu1 %v2661_v12  ;;  %v2630_v57 = vpop.xlane.xlu0 %2629  ;;  %v2667_v60 = vsel %vm523_vm1, %v2653_v6, 0.0 }
 0x826   : > { %v2633_v47 = vpop.xlane.xlu1 %2632  ;;  %v2640_v48 = vmul.f32 0.03125, %v2630_v57  ;;  %v2654_v13 = vmul.f32 %v4202_v8, %v4202_v8 }
 0x827   : > { %v2641_v43 = vmul.f32 0.03125, %v2633_v47  ;;  %v2655_v38 = vmul.f32 %v4204_v34, %v4204_v34 }
 0x828   : > { %v4213_v42 = vsub.f32 %v4164_v27, %v2640_v48  ;;  %v2670_v24 = vsel %vm523_vm1, %v2654_v13, 0.0 }
 0x829   : > { %v4215_v52 = vsub.f32 %v2595_v3, %v2641_v43  ;;  %2668 = vadd.xlane.f32.xlu1 %v2667_v60  ;;  %2671 = vadd.xlane.f32.xlu0 %v2670_v24  ;;  %v2673_v40 = vsel %vm523_vm1, %v2655_v38, 0.0 }
 0x82a   : > { %v2656_v1 = vmul.f32 %v4213_v42, %v4213_v42 }
 0x82b   : > { %v2657_v63 = vmul.f32 %v4215_v52, %v4215_v52 }
 0x82c   : > { %v2676_v21 = vsel %vm523_vm1, %v2656_v1, 0.0 }
 0x82d   : > { %2674 = vadd.xlane.f32.xlu1 %v2673_v40  ;;  %2677 = vadd.xlane.f32.xlu0 %v2676_v21  ;;  %v2679_v0 = vsel %vm523_vm1, %v2657_v63, 0.0 }
 0x831   : > { %2680 = vadd.xlane.f32.xlu1 %v2679_v0 }
 0x8ae   : > { %v2660_v19 = vpop.xlane.xlu0 %2659 }
 0x8af   : > { %v2682_v20 = vmul.f32 0.03125, %v2660_v19 }
 0x8b1   : > { %v2690_v26 = vadd.f32 1e-05, %v2682_v20 }
 0x8b2   : > { %v2663_v22 = vpop.xlane.xlu1 %2662  ;;  %v2666_v16 = vpop.xlane.xlu0 %2665 }
 0x8b3   : > { %3257 = vrsqrt.f32 %v2690_v26  ;;  %v2683_v18 = vmul.f32 0.03125, %v2663_v22  ;;  %v2684_v51 = vmul.f32 0.03125, %v2666_v16 }
 0x8b5   : > { %v2691_v28 = vadd.f32 1e-05, %v2683_v18  ;;  %v2692_v5 = vadd.f32 1e-05, %v2684_v51 }
 0x8b6   : > { %v2669_v27 = vpop.xlane.xlu1 %2668  ;;  %v2672_v17 = vpop.xlane.xlu0 %2671 }
 0x8b7   : > { %3259 = vrsqrt.f32 %v2691_v28  ;;  %v2685_v35 = vmul.f32 0.03125, %v2669_v27  ;;  %v2686_v29 = vmul.f32 0.03125, %v2672_v17 }
 0x8b8   : > { %3261 = vrsqrt.f32 %v2692_v5 }
 0x8b9   : > { %v2693_v32 = vadd.f32 1e-05, %v2685_v35  ;;  %v2694_v3 = vadd.f32 1e-05, %v2686_v29 }
 0x8ba   : > { %v2675_v44 = vpop.xlane.xlu1 %2674  ;;  %v2678_v46 = vpop.xlane.xlu0 %2677 }
 0x8bb   : > { %3263 = vrsqrt.f32 %v2693_v32  ;;  %v2687_v7 = vmul.f32 0.03125, %v2675_v44  ;;  %v2688_v11 = vmul.f32 0.03125, %v2678_v46 }
 0x8bc   : > { %3265 = vrsqrt.f32 %v2694_v3 }
 0x8bd   : > { %v3258_v41 = vpop.eup %3257  ;;  %v2695_v54 = vadd.f32 1e-05, %v2687_v7  ;;  %v2696_v53 = vadd.f32 1e-05, %v2688_v11 }
 0x8be   : > { %v2706_v31 = vmul.f32 %v3258_v41, %v4184_v61  ;;  %v2681_v23 = vpop.xlane.xlu1 %2680 }
 0x8bf   : > { %3267 = vrsqrt.f32 %v2695_v54  ;;  %v2689_v9 = vmul.f32 0.03125, %v2681_v23 }
 0x8c0   : > { %v2718_v58 = vmul.f32 %v2916_v45, %v2706_v31  ;;  %3269 = vrsqrt.f32 %v2696_v53 }
 0x8c1   : > { %v3260_v36 = vpop.eup %3259  ;;  %v2697_v4 = vadd.f32 1e-05, %v2689_v9 }
 0x8c2   : > { %v3262_v10 = vpop.eup %3261  ;;  %v2730_v25 = vadd.f32 %v2917_v2, %v2718_v58  ;;  %v2707_v49 = vmul.f32 %v3260_v36, %v4192_v33 }
 0x8c3   : > { %v2708_v55 = vmul.f32 %v3262_v10, %v4186_v56  ;;  %3271 = vrsqrt.f32 %v2697_v4 }
 0x8c4   : > { %2738 = vst.msk [vmem:[%s4289_s9] sm:$0xff] %vm523_vm1, %v2730_v25  ;;  %v2719_v61 = vmul.f32 %v2916_v45, %v2707_v49 }
 0x8c5   : > { %v3264_v30 = vpop.eup %3263  ;;  %v2720_v62 = vmul.f32 %v2916_v45, %v2708_v55 }
 0x8c6   : > { %v3266_v14 = vpop.eup %3265  ;;  %v2731_v37 = vadd.f32 %v2917_v2, %v2719_v61  ;;  %v2709_v50 = vmul.f32 %v3264_v30, %v4194_v39 }
 0x8c7   : > { %v2732_v59 = vadd.f32 %v2917_v2, %v2720_v62  ;;  %v2710_v15 = vmul.f32 %v3266_v14, %v4202_v8 }
 0x8c8   : > { %2739 = vst.msk [vmem:[%s4289_s9 + $0x8] sm:$0xff] %vm523_vm1, %v2731_v37  ;;  %v2721_v56 = vmul.f32 %v2916_v45, %v2709_v50 }
 0x8c9   : > { %v3268_v33 = vpop.eup %3267  ;;  %2740 = vst.msk [vmem:[%s4289_s9 + $0x10] sm:$0xff] %vm523_vm1, %v2732_v59  ;;  %v2722_v6 = vmul.f32 %v2916_v45, %v2710_v15 }
 0x8ca   : > { %v3270_v12 = vpop.eup %3269  ;;  %v2733_v57 = vadd.f32 %v2917_v2, %v2721_v56  ;;  %v2711_v39 = vmul.f32 %v3268_v33, %v4204_v34 }
 0x8cb   : > { %v2734_v47 = vadd.f32 %v2917_v2, %v2722_v6  ;;  %v2712_v8 = vmul.f32 %v3270_v12, %v4213_v42 }
 0x8cc   : > { %2741 = vst.msk [vmem:[%s4289_s9 + $0x18] sm:$0xff] %vm523_vm1, %v2733_v57  ;;  %v2723_v60 = vmul.f32 %v2916_v45, %v2711_v39 }
 0x8cd   : > { %v3272_v48 = vpop.eup %3271  ;;  %2742 = vst.msk [vmem:[%s4289_s9 + $0x20] sm:$0xff] %vm523_vm1, %v2734_v47  ;;  %v2724_v43 = vmul.f32 %v2916_v45, %v2712_v8 }
 0x8ce   : > { %v2735_v13 = vadd.f32 %v2917_v2, %v2723_v60  ;;  %v2713_v38 = vmul.f32 %v3272_v48, %v4215_v52 }
 0x8cf   : > { %v2736_v34 = vadd.f32 %v2917_v2, %v2724_v43 }
 0x8d0   : > { %2743 = vst.msk [vmem:[%s4289_s9 + $0x28] sm:$0xff] %vm523_vm1, %v2735_v13  ;;  %v2725_v42 = vmul.f32 %v2916_v45, %v2713_v38 }
 0x8d1   : > { %2744 = vst.msk [vmem:[%s4289_s9 + $0x30] sm:$0xff] %vm523_vm1, %v2736_v34 }
 0x8d2   : > { %v2737_v24 = vadd.f32 %v2917_v2, %v2725_v42 }
 0x8d4   : > { %2745 = vst.msk [vmem:[%s4289_s9 + $0x38] sm:$0xff] %vm523_vm1, %v2737_v24 }
 0x8d5 PF: > { %s19_s11 = sadd.s32 1, %s3295_s11   ;;  %s4318_s30 = smov %s3291_s10 }
 0x8d6   : > { %p16_p7 = scmp.ge.s32.totalorder %s19_s11, 5   ;;  %s4319_s10 = smov %s4321_s12 }
 0x8d8   :  { %18 = sbr.rel (!%p16_p7) target bundleno = 2 (0x2), region = 107 }

</bundles_post_ra>
